<compile_context>
chip_gen: v6e
topology: v6e:2x2x1
jax: 0.10.0
libtpu: 0.0.40
codegen_flags: <defaults>
</compile_context>

<pallas_src>
import functools
import math

import jax
import jax.numpy as jnp
import numpy as np
from jax.experimental import pallas as pl
from jax.experimental.pallas import tpu as pltpu


# ----------------------------- Pallas kernel --------------------------------
def _encoder_layer_kernel(
    xq_ref,                                   # (1, TQ, D)  f32  query rows / residual
    xkv_ref,                                  # (1, S, D)   bf16 full sequence for K/V
    wq_ref, bq_ref,                           # (HB, D, HW) bf16, (HB, 1, HW) f32
    wk_ref, bk_ref,
    wv_ref, bv_ref,
    wo_ref,                                   # (HB, HW, D) bf16
    bo_ref,                                   # (1, D) f32
    g1_ref, be1_ref,                          # (1, D)
    w1_ref, b1_ref,                           # (D, F) bf16, (1, F)
    w2_ref, b2_ref,                           # (F, D) bf16, (1, D)
    g2_ref, be2_ref,                          # (1, D)
    o_ref,                                    # (1, TQ, D)
    acc_ref,                                  # (TQ, D)  f32 scratch (attn out accum)
    xqb_ref,                                  # (TQ, D)  bf16 scratch (hoisted cast)
    ctx_ref,                                  # (TQ, HW) f32 scratch (per-block ctx)
    *, eps: float, head_dim: int, heads_per_block: int,
):
    hb = pl.program_id(2)
    n_hb = pl.num_programs(2)
    hd = head_dim
    scale = 1.0 / math.sqrt(float(hd))
    bf16 = jnp.bfloat16

    @pl.when(hb == 0)
    def _init():
        acc_ref[...] = jnp.zeros_like(acc_ref)
        xqb_ref[...] = xq_ref[0].astype(bf16)     # cast once per (b, qi) tile

    xq_b = xqb_ref[...]                            # (TQ, D) bf16
    xkv_b = xkv_ref[0]                             # (S, D)  bf16 (no in-kernel cast)

    # Wide per-head-block projections (N = heads_per_block * hd output lanes).
    # Weight stacks are VMEM-resident; dynamic first-axis index selects the block.
    q = jnp.dot(xq_b, wq_ref[hb], preferred_element_type=jnp.float32) + bq_ref[hb]   # (TQ, HW)
    k = jnp.dot(xkv_b, wk_ref[hb], preferred_element_type=jnp.float32) + bk_ref[hb]  # (S,  HW)
    v = jnp.dot(xkv_b, wv_ref[hb], preferred_element_type=jnp.float32) + bv_ref[hb]  # (S,  HW)
    q = (q * scale).astype(bf16)
    k = k.astype(bf16)
    v = v.astype(bf16)

    # Per-sub-head attention; ctx pieces land in a (TQ, HW) scratch so the
    # output projection below has the full HW contraction depth.
    for j in range(heads_per_block):
        lo, hi = j * hd, (j + 1) * hd
        qj = q[:, lo:hi]                           # (TQ, hd)
        kj = k[:, lo:hi]                           # (S, hd)
        vj = v[:, lo:hi]                           # (S, hd)
        s = jax.lax.dot_general(
            qj, kj, dimension_numbers=(((1,), (1,)), ((), ())),
            preferred_element_type=jnp.float32)    # (TQ, S), no explicit transpose
        s = s - jnp.max(s, axis=-1, keepdims=True)
        p = jnp.exp(s)
        p = p * pl.reciprocal(jnp.sum(p, axis=-1, keepdims=True), approx=True)
        ctx_ref[:, lo:hi] = jnp.dot(p.astype(bf16), vj,
                                    preferred_element_type=jnp.float32)

    # concat_h(ctx_h) @ Wo == sum over head blocks of ctx_block @ Wo_block.
    acc_ref[...] += jnp.dot(ctx_ref[...].astype(bf16), wo_ref[hb],
                            preferred_element_type=jnp.float32)            # (TQ, D)

    @pl.when(hb == n_hb - 1)
    def _finalize():
        attn = acc_ref[...] + bo_ref[...]                                   # (TQ, D)

        def layer_norm(a, g, b):
            mu = jnp.mean(a, axis=-1, keepdims=True)
            xc = a - mu
            var = jnp.mean(xc * xc, axis=-1, keepdims=True)   # biased var (PyTorch LN)
            return xc * jax.lax.rsqrt(var + eps) * g + b

        # x += dropout1(x) -> 2 * attn in eval mode; then residual + LN1.
        h1 = layer_norm(2.0 * attn + xq_ref[0], g1_ref[...], be1_ref[...])  # (TQ, D)

        # Feed-forward (bf16 matmuls, f32 accumulation / activations).
        ff = jnp.dot(h1.astype(bf16), w1_ref[...],
                     preferred_element_type=jnp.float32) + b1_ref[...]      # (TQ, F)
        ff = jnp.maximum(ff, 0.0)
        ff = jnp.dot(ff.astype(bf16), w2_ref[...],
                     preferred_element_type=jnp.float32) + b2_ref[...]      # (TQ, D)

        o_ref[0] = layer_norm(ff + h1, g2_ref[...], be2_ref[...]).astype(o_ref.dtype)


# ------------------------------ wrapper --------------------------------------
def _largest_divisor_le(n: int, cap: int) -> int:
    best = 1
    for d in range(1, n + 1):
        if n % d == 0 and d <= cap:
            best = d
    return best


def encoder_layer(x, params, *, num_heads: int, eps: float = 1e-12):
    """x: (B, S, D) float32. params: dict of f32 weights (see init_params)."""
    B, S, D = x.shape
    F = params["w1"].shape[1]
    assert D % num_heads == 0
    hd = D // num_heads

    # Heads per grid step: fill ~128 MXU output lanes on the QKV projections.
    hpb = _largest_divisor_le(num_heads, 128 // hd) if hd <= 128 else 1
    HB = num_heads // hpb          # head-block grid extent
    hbw = hpb * hd                 # head-block width

    # VMEM budget derived from the hardware (v7x = 64 MiB physical), with headroom.
    try:
        phys = int(pltpu.get_tpu_info().vmem_capacity_bytes)
    except Exception:
        phys = 64 * 1024 * 1024
    vmem_limit = max(32 * 1024 * 1024,
                     min(int(phys * 0.8), phys - 12 * 1024 * 1024))

    # Grid-constant resident bytes: QKV/O + FFN weights (bf16), vectors, bf16 xkv.
    resident = (4 * D * D + 2 * D * F) * 2 + (7 * D + F) * 4 + 2 * S * D * 2

    def tile_bytes(tq):
        xq = 2 * tq * D * 4                        # double-buffered f32 query block
        out = 2 * tq * D * 4
        scratch = tq * D * 4 + tq * D * 2 + tq * hbw * 4
        scores = 3 * tq * S * 4                    # s / p temporaries + slack
        qkv = (tq + 2 * S) * hbw * 4
        ffn = 2 * tq * F * 4
        return xq + out + scratch + scores + qkv + ffn

    budget = vmem_limit - resident - (4 << 20)
    cands = [t for t in (S, 512, 256, 128, 64, 32, 16, 8) if t <= S and S % t == 0]
    tq = cands[-1]                                  # smallest candidate as fallback
    for t in cands:                                 # prefer tq = S (no K/V recompute)
        if tile_bytes(t) <= budget:
            tq = t
            break
    if B == 1 and tq == S:                          # v7x megacore: feed both cores
        for t in cands:
            if t < S and tile_bytes(t) <= budget:
                tq = t
                break
    nq = S // tq

    bf16 = jnp.bfloat16
    # Host-side layouts: per-head-block weight stacks, single bf16 cast of x.
    wq3 = params["wq"].reshape(D, HB, hbw).transpose(1, 0, 2).astype(bf16)   # (HB, D, HW)
    wk3 = params["wk"].reshape(D, HB, hbw).transpose(1, 0, 2).astype(bf16)
    wv3 = params["wv"].reshape(D, HB, hbw).transpose(1, 0, 2).astype(bf16)
    wo3 = params["wo"].reshape(HB, hbw, D).astype(bf16)                      # (HB, HW, D)
    bq3 = params["bq"].reshape(HB, 1, hbw)
    bk3 = params["bk"].reshape(HB, 1, hbw)
    bv3 = params["bv"].reshape(HB, 1, hbw)
    w1 = params["w1"].astype(bf16)
    w2 = params["w2"].astype(bf16)
    x_kv = x.astype(bf16)                           # K/V operand: bf16, cast once on host

    # Grid-constant blocks: single-buffered, index map never changes.
    def cst(shape):
        nd = len(shape)
        return pl.BlockSpec(shape, lambda b, qi, hb, _nd=nd: (0,) * _nd,
                            pipeline_mode=pl.Buffered(1))

    # xkv changes only with b: single-buffer it unless b changes every step.
    xkv_kwargs = dict(pipeline_mode=pl.Buffered(1)) if nq * HB > 1 else {}

    in_specs = [
        pl.BlockSpec((1, tq, D), lambda b, qi, hb: (b, qi, 0)),              # x (f32): query/residual rows
        pl.BlockSpec((1, S, D), lambda b, qi, hb: (b, 0, 0), **xkv_kwargs),  # x (bf16): K/V rows
        cst((HB, D, hbw)), cst((HB, 1, hbw)),                                # wq, bq
        cst((HB, D, hbw)), cst((HB, 1, hbw)),                                # wk, bk
        cst((HB, D, hbw)), cst((HB, 1, hbw)),                                # wv, bv
        cst((HB, hbw, D)),                                                   # wo
        cst((1, D)),                                                         # bo
        cst((1, D)), cst((1, D)),                                            # g1, be1
        cst((D, F)), cst((1, F)),                                            # w1, b1
        cst((F, D)), cst((1, D)),                                            # w2, b2
        cst((1, D)), cst((1, D)),                                            # g2, be2
    ]

    kernel = functools.partial(_encoder_layer_kernel, eps=eps, head_dim=hd,
                               heads_per_block=hpb)

    return pl.pallas_call(
        kernel,
        out_shape=jax.ShapeDtypeStruct((B, S, D), x.dtype),
        grid_spec=pltpu.PrefetchScalarGridSpec(
            num_scalar_prefetch=0,
            grid=(B, nq, HB),
            in_specs=in_specs,
            out_specs=pl.BlockSpec((1, tq, D), lambda b, qi, hb: (b, qi, 0)),
            scratch_shapes=[
                pltpu.VMEM((tq, D), jnp.float32),    # attention-output accumulator
                pltpu.VMEM((tq, D), jnp.bfloat16),   # hoisted bf16 query rows
                pltpu.VMEM((tq, hbw), jnp.float32),  # per-block ctx (wide Wo contraction)
            ],
        ),
        compiler_params=pltpu.CompilerParams(
            dimension_semantics=("parallel", "parallel", "arbitrary"),
            vmem_limit_bytes=vmem_limit,
        ),
    )(
        x, x_kv,
        wq3, bq3, wk3, bk3, wv3, bv3, wo3, params["bo"],
        params["g1"], params["be1"], w1, params["b1"],
        w2, params["b2"], params["g2"], params["be2"],
    )


# ------------------------ deterministic parameter init -----------------------
def init_params(key, model_dim, num_heads, feedforward_dim):
    ks = jax.random.split(key, 12)
    s = 1.0 / np.sqrt(model_dim)
    sf = 1.0 / np.sqrt(feedforward_dim)
    rnd = lambda k, shape, sc: jax.random.normal(k, shape, jnp.float32) * sc
    return {
        "wq": rnd(ks[0], (model_dim, model_dim), s),
        "wk": rnd(ks[1], (model_dim, model_dim), s),
        "wv": rnd(ks[2], (model_dim, model_dim), s),
        "wo": rnd(ks[3], (model_dim, model_dim), s),
        "bq": rnd(ks[4], (1, model_dim), 0.1),
        "bk": rnd(ks[5], (1, model_dim), 0.1),
        "bv": rnd(ks[6], (1, model_dim), 0.1),
        "bo": rnd(ks[7], (1, model_dim), 0.1),
        "w1": rnd(ks[8], (model_dim, feedforward_dim), s),
        "b1": rnd(ks[9], (1, feedforward_dim), 0.1),
        "w2": rnd(ks[10], (feedforward_dim, model_dim), sf),
        "b2": rnd(ks[11], (1, model_dim), 0.1),
        "g1": jnp.ones((1, model_dim), jnp.float32),
        "be1": jnp.zeros((1, model_dim), jnp.float32),
        "g2": jnp.ones((1, model_dim), jnp.float32),
        "be2": jnp.zeros((1, model_dim), jnp.float32),
    }


# --------------------------- pure-JAX reference -------------------------------
def encoder_layer_ref(x, p, num_heads, eps=1e-12):
    B, S, D = x.shape
    hd = D // num_heads

    def lin(a, w, b):
        return a @ w + b

    q = lin(x, p["wq"], p["bq"]).reshape(B, S, num_heads, hd).transpose(0, 2, 1, 3)
    k = lin(x, p["wk"], p["bk"]).reshape(B, S, num_heads, hd).transpose(0, 2, 1, 3)
    v = lin(x, p["wv"], p["bv"]).reshape(B, S, num_heads, hd).transpose(0, 2, 1, 3)
    scores = jnp.einsum("bhqd,bhkd->bhqk", q, k) / np.sqrt(hd)
    probs = jax.nn.softmax(scores, axis=-1)
    attn = jnp.einsum("bhqk,bhkd->bhqd", probs, v).transpose(0, 2, 1, 3).reshape(B, S, D)
    attn = lin(attn, p["wo"], p["bo"])

    def ln(a, g, b):
        mu = a.mean(-1, keepdims=True)
        var = ((a - mu) ** 2).mean(-1, keepdims=True)
        return (a - mu) / jnp.sqrt(var + eps) * g + b

    h1 = ln(2.0 * attn + x, p["g1"], p["be1"])
    ff = lin(jnp.maximum(lin(h1, p["w1"], p["b1"]), 0.0), p["w2"], p["b2"])
    return ln(ff + h1, p["g2"], p["be2"])


if __name__ == "__main__":
    B, S, D, H, F = 2, 8, 32, 4, 64
    key = jax.random.PRNGKey(0)
    kx, kp = jax.random.split(key)
    x = jax.random.normal(kx, (B, S, D), jnp.float32)
    params = init_params(kp, D, H, F)

    # Pre-round the big matmul weights to bf16-representable values so the f32
    # reference and the bf16-matmul kernel see identical weights; remaining
    # differences come only from bf16 activation rounding + approx reciprocal.
    for name in ("wq", "wk", "wv", "wo", "w1", "w2"):
        params[name] = params[name].astype(jnp.bfloat16).astype(jnp.float32)

    out = jax.block_until_ready(encoder_layer(x, params, num_heads=H))
    ref = encoder_layer_ref(x, params, H)
    np.testing.assert_allclose(np.asarray(out), np.asarray(ref), rtol=3e-2, atol=3e-2)
    print("KERNEL_OK")
</pallas_src>

<mosaic_0001>
module attributes {stable_mosaic.version = 11 : i64} {
  func.func @_encoder_layer_kernel(%arg0: i32, %arg1: i32, %arg2: i32, %arg3: memref<1x8x32xf32, #tpu.memory_space<vmem>>, %arg4: memref<1x8x32xbf16, #tpu.memory_space<vmem>>, %arg5: memref<1x32x32xbf16, #tpu.memory_space<vmem>>, %arg6: memref<1x1x32xf32, #tpu.memory_space<vmem>>, %arg7: memref<1x32x32xbf16, #tpu.memory_space<vmem>>, %arg8: memref<1x1x32xf32, #tpu.memory_space<vmem>>, %arg9: memref<1x32x32xbf16, #tpu.memory_space<vmem>>, %arg10: memref<1x1x32xf32, #tpu.memory_space<vmem>>, %arg11: memref<1x32x32xbf16, #tpu.memory_space<vmem>>, %arg12: memref<1x32xf32, #tpu.memory_space<vmem>>, %arg13: memref<1x32xf32, #tpu.memory_space<vmem>>, %arg14: memref<1x32xf32, #tpu.memory_space<vmem>>, %arg15: memref<32x64xbf16, #tpu.memory_space<vmem>>, %arg16: memref<1x64xf32, #tpu.memory_space<vmem>>, %arg17: memref<64x32xbf16, #tpu.memory_space<vmem>>, %arg18: memref<1x32xf32, #tpu.memory_space<vmem>>, %arg19: memref<1x32xf32, #tpu.memory_space<vmem>>, %arg20: memref<1x32xf32, #tpu.memory_space<vmem>>, %arg21: memref<1x8x32xf32, #tpu.memory_space<vmem>>, %arg22: memref<8x32xf32, #tpu.memory_space<vmem>>, %arg23: memref<8x32xbf16, #tpu.memory_space<vmem>>, %arg24: memref<8x32xf32, #tpu.memory_space<vmem>>) attributes {dimension_semantics = [#tpu.dimension_semantics<parallel>, #tpu.dimension_semantics<parallel>, #tpu.dimension_semantics<arbitrary>], iteration_bounds = array<i64: 2, 1, 1>, scalar_prefetch = 0 : i64, scratch_operands = 3 : i64, tpu.core_type = #tpu.core_type<tc>, window_params = [{transform_indices = @transform_0, window_bounds = array<i64: 1, 8, 32>}, {transform_indices = @transform_1, window_bounds = array<i64: 1, 8, 32>}, {pipeline_mode = #tpu.pipeline_mode<synchronous>, transform_indices = @transform_2, window_bounds = array<i64: 1, 32, 32>}, {pipeline_mode = #tpu.pipeline_mode<synchronous>, transform_indices = @transform_3, window_bounds = array<i64: 1, 1, 32>}, {pipeline_mode = #tpu.pipeline_mode<synchronous>, transform_indices = @transform_4, window_bounds = array<i64: 1, 32, 32>}, {pipeline_mode = #tpu.pipeline_mode<synchronous>, transform_indices = @transform_5, window_bounds = array<i64: 1, 1, 32>}, {pipeline_mode = #tpu.pipeline_mode<synchronous>, transform_indices = @transform_6, window_bounds = array<i64: 1, 32, 32>}, {pipeline_mode = #tpu.pipeline_mode<synchronous>, transform_indices = @transform_7, window_bounds = array<i64: 1, 1, 32>}, {pipeline_mode = #tpu.pipeline_mode<synchronous>, transform_indices = @transform_8, window_bounds = array<i64: 1, 32, 32>}, {pipeline_mode = #tpu.pipeline_mode<synchronous>, transform_indices = @transform_9, window_bounds = array<i64: 1, 32>}, {pipeline_mode = #tpu.pipeline_mode<synchronous>, transform_indices = @transform_10, window_bounds = array<i64: 1, 32>}, {pipeline_mode = #tpu.pipeline_mode<synchronous>, transform_indices = @transform_11, window_bounds = array<i64: 1, 32>}, {pipeline_mode = #tpu.pipeline_mode<synchronous>, transform_indices = @transform_12, window_bounds = array<i64: 32, 64>}, {pipeline_mode = #tpu.pipeline_mode<synchronous>, transform_indices = @transform_13, window_bounds = array<i64: 1, 64>}, {pipeline_mode = #tpu.pipeline_mode<synchronous>, transform_indices = @transform_14, window_bounds = array<i64: 64, 32>}, {pipeline_mode = #tpu.pipeline_mode<synchronous>, transform_indices = @transform_15, window_bounds = array<i64: 1, 32>}, {pipeline_mode = #tpu.pipeline_mode<synchronous>, transform_indices = @transform_16, window_bounds = array<i64: 1, 32>}, {pipeline_mode = #tpu.pipeline_mode<synchronous>, transform_indices = @transform_17, window_bounds = array<i64: 1, 32>}, {transform_indices = @transform_18, window_bounds = array<i64: 1, 8, 32>}]} {
    %c0_i32 = arith.constant 0 : i32
    %0 = arith.cmpi eq, %arg2, %c0_i32 : i32
    %1 = arith.extui %0 : i1 to i32
    %c0_i32_0 = arith.constant 0 : i32
    %2 = arith.cmpi ne, %1, %c0_i32_0 : i32
    scf.if %2 {
      %cst_52 = arith.constant 0.000000e+00 : f32
      %118 = vector.broadcast %cst_52 : f32 to vector<8x32xf32>
      %c0_53 = arith.constant 0 : index
      %c0_54 = arith.constant 0 : index
      %119 = vector.load %arg22[%c0_53, %c0_54] : memref<8x32xf32, #tpu.memory_space<vmem>>, vector<8x32xf32>
      tpu.vector_store %arg22[%c0_53, %c0_54], %118 {strides = array<i32>} : memref<8x32xf32, #tpu.memory_space<vmem>>, vector<8x32xf32>,
      %c0_55 = arith.constant 0 : index
      %c0_56 = arith.constant 0 : index
      %c0_57 = arith.constant 0 : index
      %120 = vector.load %arg3[%c0_55, %c0_56, %c0_57] : memref<1x8x32xf32, #tpu.memory_space<vmem>>, vector<1x8x32xf32>
      %121 = vector.shape_cast %120 : vector<1x8x32xf32> to vector<8x32xf32>
      %122 = arith.truncf %121 : vector<8x32xf32> to vector<8x32xbf16>
      %c0_58 = arith.constant 0 : index
      %c0_59 = arith.constant 0 : index
      %123 = vector.load %arg23[%c0_58, %c0_59] : memref<8x32xbf16, #tpu.memory_space<vmem>>, vector<8x32xbf16>
      tpu.vector_store %arg23[%c0_58, %c0_59], %122 {strides = array<i32>} : memref<8x32xbf16, #tpu.memory_space<vmem>>, vector<8x32xbf16>,
    } else {
    }
    %c0 = arith.constant 0 : index
    %c0_1 = arith.constant 0 : index
    %3 = vector.load %arg23[%c0, %c0_1] : memref<8x32xbf16, #tpu.memory_space<vmem>>, vector<8x32xbf16>
    %c0_2 = arith.constant 0 : index
    %c0_3 = arith.constant 0 : index
    %c0_4 = arith.constant 0 : index
    %4 = vector.load %arg4[%c0_2, %c0_3, %c0_4] : memref<1x8x32xbf16, #tpu.memory_space<vmem>>, vector<1x8x32xbf16>
    %5 = vector.shape_cast %4 : vector<1x8x32xbf16> to vector<8x32xbf16>
    %6 = arith.index_cast %arg2 : i32 to index
    %c0_5 = arith.constant 0 : index
    %c0_6 = arith.constant 0 : index
    %7 = vector.load %arg5[%6, %c0_5, %c0_6] : memref<1x32x32xbf16, #tpu.memory_space<vmem>>, vector<1x32x32xbf16>
    %8 = vector.shape_cast %7 : vector<1x32x32xbf16> to vector<32x32xbf16>
    %cst = arith.constant dense<0.000000e+00> : vector<8x32xf32>
    %9 = tpu.matmul %3, %8, %cst {dimension_numbers = #tpu.dot_dimension_numbers<[1], [0], [0], [1], [0, 0, 1, 1], [], []>} : vector<8x32xbf16>, vector<32x32xbf16>, vector<8x32xf32> -> vector<8x32xf32>
    %10 = arith.index_cast %arg2 : i32 to index
    %c0_7 = arith.constant 0 : index
    %c0_8 = arith.constant 0 : index
    %11 = vector.load %arg6[%10, %c0_7, %c0_8] : memref<1x1x32xf32, #tpu.memory_space<vmem>>, vector<1x1x32xf32>
    %12 = vector.shape_cast %11 : vector<1x1x32xf32> to vector<1x32xf32>
    %13 = vector.broadcast %12 : vector<1x32xf32> to vector<8x32xf32>
    %14 = arith.addf %9, %13 : vector<8x32xf32>
    %15 = arith.index_cast %arg2 : i32 to index
    %c0_9 = arith.constant 0 : index
    %c0_10 = arith.constant 0 : index
    %16 = vector.load %arg7[%15, %c0_9, %c0_10] : memref<1x32x32xbf16, #tpu.memory_space<vmem>>, vector<1x32x32xbf16>
    %17 = vector.shape_cast %16 : vector<1x32x32xbf16> to vector<32x32xbf16>
    %cst_11 = arith.constant dense<0.000000e+00> : vector<8x32xf32>
    %18 = tpu.matmul %5, %17, %cst_11 {dimension_numbers = #tpu.dot_dimension_numbers<[1], [0], [0], [1], [0, 0, 1, 1], [], []>} : vector<8x32xbf16>, vector<32x32xbf16>, vector<8x32xf32> -> vector<8x32xf32>
    %19 = arith.index_cast %arg2 : i32 to index
    %c0_12 = arith.constant 0 : index
    %c0_13 = arith.constant 0 : index
    %20 = vector.load %arg8[%19, %c0_12, %c0_13] : memref<1x1x32xf32, #tpu.memory_space<vmem>>, vector<1x1x32xf32>
    %21 = vector.shape_cast %20 : vector<1x1x32xf32> to vector<1x32xf32>
    %22 = vector.broadcast %21 : vector<1x32xf32> to vector<8x32xf32>
    %23 = arith.addf %18, %22 : vector<8x32xf32>
    %24 = arith.index_cast %arg2 : i32 to index
    %c0_14 = arith.constant 0 : index
    %c0_15 = arith.constant 0 : index
    %25 = vector.load %arg9[%24, %c0_14, %c0_15] : memref<1x32x32xbf16, #tpu.memory_space<vmem>>, vector<1x32x32xbf16>
    %26 = vector.shape_cast %25 : vector<1x32x32xbf16> to vector<32x32xbf16>
    %cst_16 = arith.constant dense<0.000000e+00> : vector<8x32xf32>
    %27 = tpu.matmul %5, %26, %cst_16 {dimension_numbers = #tpu.dot_dimension_numbers<[1], [0], [0], [1], [0, 0, 1, 1], [], []>} : vector<8x32xbf16>, vector<32x32xbf16>, vector<8x32xf32> -> vector<8x32xf32>
    %28 = arith.index_cast %arg2 : i32 to index
    %c0_17 = arith.constant 0 : index
    %c0_18 = arith.constant 0 : index
    %29 = vector.load %arg10[%28, %c0_17, %c0_18] : memref<1x1x32xf32, #tpu.memory_space<vmem>>, vector<1x1x32xf32>
    %30 = vector.shape_cast %29 : vector<1x1x32xf32> to vector<1x32xf32>
    %31 = vector.broadcast %30 : vector<1x32xf32> to vector<8x32xf32>
    %32 = arith.addf %27, %31 : vector<8x32xf32>
    %cst_19 = arith.constant 0.353553385 : f32
    %33 = vector.broadcast %cst_19 : f32 to vector<8x32xf32>
    %34 = arith.mulf %14, %33 : vector<8x32xf32>
    %35 = arith.truncf %34 : vector<8x32xf32> to vector<8x32xbf16>
    %36 = arith.truncf %23 : vector<8x32xf32> to vector<8x32xbf16>
    %37 = arith.truncf %32 : vector<8x32xf32> to vector<8x32xbf16>
    %38 = vector.extract_strided_slice %35 {offsets = [0, 0], sizes = [8, 8], strides = [1, 1]} : vector<8x32xbf16> to vector<8x8xbf16>
    %39 = vector.extract_strided_slice %36 {offsets = [0, 0], sizes = [8, 8], strides = [1, 1]} : vector<8x32xbf16> to vector<8x8xbf16>
    %40 = vector.extract_strided_slice %37 {offsets = [0, 0], sizes = [8, 8], strides = [1, 1]} : vector<8x32xbf16> to vector<8x8xbf16>
    %cst_20 = arith.constant dense<0.000000e+00> : vector<8x8xf32>
    %41 = tpu.matmul %38, %39, %cst_20 {dimension_numbers = #tpu.dot_dimension_numbers<[1], [1], [0], [0], [0, 0, 1, 0], [], []>} : vector<8x8xbf16>, vector<8x8xbf16>, vector<8x8xf32> -> vector<8x8xf32>
    %cst_21 = arith.constant dense<0xFF800000> : vector<8xf32>
    %42 = vector.multi_reduction <maximumf>, %41, %cst_21 [1] : vector<8x8xf32> to vector<8xf32>
    %43 = vector.shape_cast %42 : vector<8xf32> to vector<8x1xf32>
    %44 = vector.broadcast %43 : vector<8x1xf32> to vector<8x8xf32>
    %45 = arith.subf %41, %44 : vector<8x8xf32>
    %46 = math.exp %45 : vector<8x8xf32>
    %cst_22 = arith.constant dense<0.000000e+00> : vector<8xf32>
    %47 = vector.multi_reduction <add>, %46, %cst_22 [1] : vector<8x8xf32> to vector<8xf32>
    %48 = vector.shape_cast %47 : vector<8xf32> to vector<8x1xf32>
    %49 = tpu.reciprocal %48 {approx = true} : vector<8x1xf32> -> vector<8x1xf32>
    %50 = vector.broadcast %49 : vector<8x1xf32> to vector<8x8xf32>
    %51 = arith.mulf %46, %50 : vector<8x8xf32>
    %52 = arith.truncf %51 : vector<8x8xf32> to vector<8x8xbf16>
    %cst_23 = arith.constant dense<0.000000e+00> : vector<8x8xf32>
    %53 = tpu.matmul %52, %40, %cst_23 {dimension_numbers = #tpu.dot_dimension_numbers<[1], [0], [0], [1], [0, 0, 1, 1], [], []>} : vector<8x8xbf16>, vector<8x8xbf16>, vector<8x8xf32> -> vector<8x8xf32>
    %c0_24 = arith.constant 0 : index
    %c0_25 = arith.constant 0 : index
    %54 = vector.load %arg24[%c0_24, %c0_25] : memref<8x32xf32, #tpu.memory_space<vmem>>, vector<8x8xf32>
    tpu.vector_store %arg24[%c0_24, %c0_25], %53 {strides = array<i32>} : memref<8x32xf32, #tpu.memory_space<vmem>>, vector<8x8xf32>,
    %55 = vector.extract_strided_slice %35 {offsets = [0, 8], sizes = [8, 8], strides = [1, 1]} : vector<8x32xbf16> to vector<8x8xbf16>
    %56 = vector.extract_strided_slice %36 {offsets = [0, 8], sizes = [8, 8], strides = [1, 1]} : vector<8x32xbf16> to vector<8x8xbf16>
    %57 = vector.extract_strided_slice %37 {offsets = [0, 8], sizes = [8, 8], strides = [1, 1]} : vector<8x32xbf16> to vector<8x8xbf16>
    %cst_26 = arith.constant dense<0.000000e+00> : vector<8x8xf32>
    %58 = tpu.matmul %55, %56, %cst_26 {dimension_numbers = #tpu.dot_dimension_numbers<[1], [1], [0], [0], [0, 0, 1, 0], [], []>} : vector<8x8xbf16>, vector<8x8xbf16>, vector<8x8xf32> -> vector<8x8xf32>
    %cst_27 = arith.constant dense<0xFF800000> : vector<8xf32>
    %59 = vector.multi_reduction <maximumf>, %58, %cst_27 [1] : vector<8x8xf32> to vector<8xf32>
    %60 = vector.shape_cast %59 : vector<8xf32> to vector<8x1xf32>
    %61 = vector.broadcast %60 : vector<8x1xf32> to vector<8x8xf32>
    %62 = arith.subf %58, %61 : vector<8x8xf32>
    %63 = math.exp %62 : vector<8x8xf32>
    %cst_28 = arith.constant dense<0.000000e+00> : vector<8xf32>
    %64 = vector.multi_reduction <add>, %63, %cst_28 [1] : vector<8x8xf32> to vector<8xf32>
    %65 = vector.shape_cast %64 : vector<8xf32> to vector<8x1xf32>
    %66 = tpu.reciprocal %65 {approx = true} : vector<8x1xf32> -> vector<8x1xf32>
    %67 = vector.broadcast %66 : vector<8x1xf32> to vector<8x8xf32>
    %68 = arith.mulf %63, %67 : vector<8x8xf32>
    %69 = arith.truncf %68 : vector<8x8xf32> to vector<8x8xbf16>
    %cst_29 = arith.constant dense<0.000000e+00> : vector<8x8xf32>
    %70 = tpu.matmul %69, %57, %cst_29 {dimension_numbers = #tpu.dot_dimension_numbers<[1], [0], [0], [1], [0, 0, 1, 1], [], []>} : vector<8x8xbf16>, vector<8x8xbf16>, vector<8x8xf32> -> vector<8x8xf32>
    %c0_30 = arith.constant 0 : index
    %c8 = arith.constant 8 : index
    %71 = vector.load %arg24[%c0_30, %c8] : memref<8x32xf32, #tpu.memory_space<vmem>>, vector<8x8xf32>
    tpu.vector_store %arg24[%c0_30, %c8], %70 {strides = array<i32>} : memref<8x32xf32, #tpu.memory_space<vmem>>, vector<8x8xf32>,
    %72 = vector.extract_strided_slice %35 {offsets = [0, 16], sizes = [8, 8], strides = [1, 1]} : vector<8x32xbf16> to vector<8x8xbf16>
    %73 = vector.extract_strided_slice %36 {offsets = [0, 16], sizes = [8, 8], strides = [1, 1]} : vector<8x32xbf16> to vector<8x8xbf16>
    %74 = vector.extract_strided_slice %37 {offsets = [0, 16], sizes = [8, 8], strides = [1, 1]} : vector<8x32xbf16> to vector<8x8xbf16>
    %cst_31 = arith.constant dense<0.000000e+00> : vector<8x8xf32>
    %75 = tpu.matmul %72, %73, %cst_31 {dimension_numbers = #tpu.dot_dimension_numbers<[1], [1], [0], [0], [0, 0, 1, 0], [], []>} : vector<8x8xbf16>, vector<8x8xbf16>, vector<8x8xf32> -> vector<8x8xf32>
    %cst_32 = arith.constant dense<0xFF800000> : vector<8xf32>
    %76 = vector.multi_reduction <maximumf>, %75, %cst_32 [1] : vector<8x8xf32> to vector<8xf32>
    %77 = vector.shape_cast %76 : vector<8xf32> to vector<8x1xf32>
    %78 = vector.broadcast %77 : vector<8x1xf32> to vector<8x8xf32>
    %79 = arith.subf %75, %78 : vector<8x8xf32>
    %80 = math.exp %79 : vector<8x8xf32>
    %cst_33 = arith.constant dense<0.000000e+00> : vector<8xf32>
    %81 = vector.multi_reduction <add>, %80, %cst_33 [1] : vector<8x8xf32> to vector<8xf32>
    %82 = vector.shape_cast %81 : vector<8xf32> to vector<8x1xf32>
    %83 = tpu.reciprocal %82 {approx = true} : vector<8x1xf32> -> vector<8x1xf32>
    %84 = vector.broadcast %83 : vector<8x1xf32> to vector<8x8xf32>
    %85 = arith.mulf %80, %84 : vector<8x8xf32>
    %86 = arith.truncf %85 : vector<8x8xf32> to vector<8x8xbf16>
    %cst_34 = arith.constant dense<0.000000e+00> : vector<8x8xf32>
    %87 = tpu.matmul %86, %74, %cst_34 {dimension_numbers = #tpu.dot_dimension_numbers<[1], [0], [0], [1], [0, 0, 1, 1], [], []>} : vector<8x8xbf16>, vector<8x8xbf16>, vector<8x8xf32> -> vector<8x8xf32>
    %c0_35 = arith.constant 0 : index
    %c16 = arith.constant 16 : index
    %88 = vector.load %arg24[%c0_35, %c16] : memref<8x32xf32, #tpu.memory_space<vmem>>, vector<8x8xf32>
    tpu.vector_store %arg24[%c0_35, %c16], %87 {strides = array<i32>} : memref<8x32xf32, #tpu.memory_space<vmem>>, vector<8x8xf32>,
    %89 = vector.extract_strided_slice %35 {offsets = [0, 24], sizes = [8, 8], strides = [1, 1]} : vector<8x32xbf16> to vector<8x8xbf16>
    %90 = vector.extract_strided_slice %36 {offsets = [0, 24], sizes = [8, 8], strides = [1, 1]} : vector<8x32xbf16> to vector<8x8xbf16>
    %91 = vector.extract_strided_slice %37 {offsets = [0, 24], sizes = [8, 8], strides = [1, 1]} : vector<8x32xbf16> to vector<8x8xbf16>
    %cst_36 = arith.constant dense<0.000000e+00> : vector<8x8xf32>
    %92 = tpu.matmul %89, %90, %cst_36 {dimension_numbers = #tpu.dot_dimension_numbers<[1], [1], [0], [0], [0, 0, 1, 0], [], []>} : vector<8x8xbf16>, vector<8x8xbf16>, vector<8x8xf32> -> vector<8x8xf32>
    %cst_37 = arith.constant dense<0xFF800000> : vector<8xf32>
    %93 = vector.multi_reduction <maximumf>, %92, %cst_37 [1] : vector<8x8xf32> to vector<8xf32>
    %94 = vector.shape_cast %93 : vector<8xf32> to vector<8x1xf32>
    %95 = vector.broadcast %94 : vector<8x1xf32> to vector<8x8xf32>
    %96 = arith.subf %92, %95 : vector<8x8xf32>
    %97 = math.exp %96 : vector<8x8xf32>
    %cst_38 = arith.constant dense<0.000000e+00> : vector<8xf32>
    %98 = vector.multi_reduction <add>, %97, %cst_38 [1] : vector<8x8xf32> to vector<8xf32>
    %99 = vector.shape_cast %98 : vector<8xf32> to vector<8x1xf32>
    %100 = tpu.reciprocal %99 {approx = true} : vector<8x1xf32> -> vector<8x1xf32>
    %101 = vector.broadcast %100 : vector<8x1xf32> to vector<8x8xf32>
    %102 = arith.mulf %97, %101 : vector<8x8xf32>
    %103 = arith.truncf %102 : vector<8x8xf32> to vector<8x8xbf16>
    %cst_39 = arith.constant dense<0.000000e+00> : vector<8x8xf32>
    %104 = tpu.matmul %103, %91, %cst_39 {dimension_numbers = #tpu.dot_dimension_numbers<[1], [0], [0], [1], [0, 0, 1, 1], [], []>} : vector<8x8xbf16>, vector<8x8xbf16>, vector<8x8xf32> -> vector<8x8xf32>
    %c0_40 = arith.constant 0 : index
    %c24 = arith.constant 24 : index
    %105 = vector.load %arg24[%c0_40, %c24] : memref<8x32xf32, #tpu.memory_space<vmem>>, vector<8x8xf32>
    tpu.vector_store %arg24[%c0_40, %c24], %104 {strides = array<i32>} : memref<8x32xf32, #tpu.memory_space<vmem>>, vector<8x8xf32>,
    %c0_41 = arith.constant 0 : index
    %c0_42 = arith.constant 0 : index
    %106 = vector.load %arg22[%c0_41, %c0_42] : memref<8x32xf32, #tpu.memory_space<vmem>>, vector<8x32xf32>
    %c0_43 = arith.constant 0 : index
    %c0_44 = arith.constant 0 : index
    %107 = vector.load %arg24[%c0_43, %c0_44] : memref<8x32xf32, #tpu.memory_space<vmem>>, vector<8x32xf32>
    %108 = arith.truncf %107 : vector<8x32xf32> to vector<8x32xbf16>
    %109 = arith.index_cast %arg2 : i32 to index
    %c0_45 = arith.constant 0 : index
    %c0_46 = arith.constant 0 : index
    %110 = vector.load %arg11[%109, %c0_45, %c0_46] : memref<1x32x32xbf16, #tpu.memory_space<vmem>>, vector<1x32x32xbf16>
    %111 = vector.shape_cast %110 : vector<1x32x32xbf16> to vector<32x32xbf16>
    %cst_47 = arith.constant dense<0.000000e+00> : vector<8x32xf32>
    %112 = tpu.matmul %108, %111, %cst_47 {dimension_numbers = #tpu.dot_dimension_numbers<[1], [0], [0], [1], [0, 0, 1, 1], [], []>} : vector<8x32xbf16>, vector<32x32xbf16>, vector<8x32xf32> -> vector<8x32xf32>
    %113 = arith.addf %106, %112 : vector<8x32xf32>
    %c0_48 = arith.constant 0 : index
    %c0_49 = arith.constant 0 : index
    %114 = vector.load %arg22[%c0_48, %c0_49] : memref<8x32xf32, #tpu.memory_space<vmem>>, vector<8x32xf32>
    tpu.vector_store %arg22[%c0_48, %c0_49], %113 {strides = array<i32>} : memref<8x32xf32, #tpu.memory_space<vmem>>, vector<8x32xf32>,
    %c0_i32_50 = arith.constant 0 : i32
    %115 = arith.cmpi eq, %arg2, %c0_i32_50 : i32
    %116 = arith.extui %115 : i1 to i32
    %c0_i32_51 = arith.constant 0 : i32
    %117 = arith.cmpi ne, %116, %c0_i32_51 : i32
    scf.if %117 {
      %c0_52 = arith.constant 0 : index
      %c0_53 = arith.constant 0 : index
      %118 = vector.load %arg22[%c0_52, %c0_53] : memref<8x32xf32, #tpu.memory_space<vmem>>, vector<8x32xf32>
      %c0_54 = arith.constant 0 : index
      %c0_55 = arith.constant 0 : index
      %119 = vector.load %arg12[%c0_54, %c0_55] : memref<1x32xf32, #tpu.memory_space<vmem>>, vector<1x32xf32>
      %120 = vector.broadcast %119 : vector<1x32xf32> to vector<8x32xf32>
      %121 = arith.addf %118, %120 : vector<8x32xf32>
      %cst_56 = arith.constant 2.000000e+00 : f32
      %122 = vector.broadcast %cst_56 : f32 to vector<8x32xf32>
      %123 = arith.mulf %122, %121 : vector<8x32xf32>
      %c0_57 = arith.constant 0 : index
      %c0_58 = arith.constant 0 : index
      %c0_59 = arith.constant 0 : index
      %124 = vector.load %arg3[%c0_57, %c0_58, %c0_59] : memref<1x8x32xf32, #tpu.memory_space<vmem>>, vector<1x8x32xf32>
      %125 = vector.shape_cast %124 : vector<1x8x32xf32> to vector<8x32xf32>
      %126 = arith.addf %123, %125 : vector<8x32xf32>
      %c0_60 = arith.constant 0 : index
      %c0_61 = arith.constant 0 : index
      %127 = vector.load %arg13[%c0_60, %c0_61] : memref<1x32xf32, #tpu.memory_space<vmem>>, vector<1x32xf32>
      %c0_62 = arith.constant 0 : index
      %c0_63 = arith.constant 0 : index
      %128 = vector.load %arg14[%c0_62, %c0_63] : memref<1x32xf32, #tpu.memory_space<vmem>>, vector<1x32xf32>
      %cst_64 = arith.constant dense<0.000000e+00> : vector<8xf32>
      %129 = vector.multi_reduction <add>, %126, %cst_64 [1] : vector<8x32xf32> to vector<8xf32>
      %130 = vector.shape_cast %129 : vector<8xf32> to vector<8x1xf32>
      %cst_65 = arith.constant 3.200000e+01 : f32
      %131 = vector.broadcast %cst_65 : f32 to vector<8x1xf32>
      %132 = arith.divf %130, %131 : vector<8x1xf32>
      %133 = vector.broadcast %132 : vector<8x1xf32> to vector<8x32xf32>
      %134 = arith.subf %126, %133 : vector<8x32xf32>
      %135 = arith.mulf %134, %134 : vector<8x32xf32>
      %cst_66 = arith.constant dense<0.000000e+00> : vector<8xf32>
      %136 = vector.multi_reduction <add>, %135, %cst_66 [1] : vector<8x32xf32> to vector<8xf32>
      %137 = vector.shape_cast %136 : vector<8xf32> to vector<8x1xf32>
      %cst_67 = arith.constant 3.200000e+01 : f32
      %138 = vector.broadcast %cst_67 : f32 to vector<8x1xf32>
      %139 = arith.divf %137, %138 : vector<8x1xf32>
      %cst_68 = arith.constant 9.99999996E-13 : f32
      %140 = vector.broadcast %cst_68 : f32 to vector<8x1xf32>
      %141 = arith.addf %139, %140 : vector<8x1xf32>
      %142 = math.rsqrt %141 : vector<8x1xf32>
      %143 = vector.broadcast %142 : vector<8x1xf32> to vector<8x32xf32>
      %144 = arith.mulf %134, %143 : vector<8x32xf32>
      %145 = vector.broadcast %127 : vector<1x32xf32> to vector<8x32xf32>
      %146 = arith.mulf %144, %145 : vector<8x32xf32>
      %147 = vector.broadcast %128 : vector<1x32xf32> to vector<8x32xf32>
      %148 = arith.addf %146, %147 : vector<8x32xf32>
      %149 = arith.truncf %148 : vector<8x32xf32> to vector<8x32xbf16>
      %c0_69 = arith.constant 0 : index
      %c0_70 = arith.constant 0 : index
      %150 = vector.load %arg15[%c0_69, %c0_70] : memref<32x64xbf16, #tpu.memory_space<vmem>>, vector<32x64xbf16>
      %cst_71 = arith.constant dense<0.000000e+00> : vector<8x64xf32>
      %151 = tpu.matmul %149, %150, %cst_71 {dimension_numbers = #tpu.dot_dimension_numbers<[1], [0], [0], [1], [0, 0, 1, 1], [], []>} : vector<8x32xbf16>, vector<32x64xbf16>, vector<8x64xf32> -> vector<8x64xf32>
      %c0_72 = arith.constant 0 : index
      %c0_73 = arith.constant 0 : index
      %152 = vector.load %arg16[%c0_72, %c0_73] : memref<1x64xf32, #tpu.memory_space<vmem>>, vector<1x64xf32>
      %153 = vector.broadcast %152 : vector<1x64xf32> to vector<8x64xf32>
      %154 = arith.addf %151, %153 : vector<8x64xf32>
      %cst_74 = arith.constant 0.000000e+00 : f32
      %155 = vector.broadcast %cst_74 : f32 to vector<8x64xf32>
      %156 = arith.maximumf %154, %155 : vector<8x64xf32>
      %157 = arith.truncf %156 : vector<8x64xf32> to vector<8x64xbf16>
      %c0_75 = arith.constant 0 : index
      %c0_76 = arith.constant 0 : index
      %158 = vector.load %arg17[%c0_75, %c0_76] : memref<64x32xbf16, #tpu.memory_space<vmem>>, vector<64x32xbf16>
      %cst_77 = arith.constant dense<0.000000e+00> : vector<8x32xf32>
      %159 = tpu.matmul %157, %158, %cst_77 {dimension_numbers = #tpu.dot_dimension_numbers<[1], [0], [0], [1], [0, 0, 1, 1], [], []>} : vector<8x64xbf16>, vector<64x32xbf16>, vector<8x32xf32> -> vector<8x32xf32>
      %c0_78 = arith.constant 0 : index
      %c0_79 = arith.constant 0 : index
      %160 = vector.load %arg18[%c0_78, %c0_79] : memref<1x32xf32, #tpu.memory_space<vmem>>, vector<1x32xf32>
      %161 = vector.broadcast %160 : vector<1x32xf32> to vector<8x32xf32>
      %162 = arith.addf %159, %161 : vector<8x32xf32>
      %163 = arith.addf %162, %148 : vector<8x32xf32>
      %c0_80 = arith.constant 0 : index
      %c0_81 = arith.constant 0 : index
      %164 = vector.load %arg19[%c0_80, %c0_81] : memref<1x32xf32, #tpu.memory_space<vmem>>, vector<1x32xf32>
      %c0_82 = arith.constant 0 : index
      %c0_83 = arith.constant 0 : index
      %165 = vector.load %arg20[%c0_82, %c0_83] : memref<1x32xf32, #tpu.memory_space<vmem>>, vector<1x32xf32>
      %cst_84 = arith.constant dense<0.000000e+00> : vector<8xf32>
      %166 = vector.multi_reduction <add>, %163, %cst_84 [1] : vector<8x32xf32> to vector<8xf32>
      %167 = vector.shape_cast %166 : vector<8xf32> to vector<8x1xf32>
      %cst_85 = arith.constant 3.200000e+01 : f32
      %168 = vector.broadcast %cst_85 : f32 to vector<8x1xf32>
      %169 = arith.divf %167, %168 : vector<8x1xf32>
      %170 = vector.broadcast %169 : vector<8x1xf32> to vector<8x32xf32>
      %171 = arith.subf %163, %170 : vector<8x32xf32>
      %172 = arith.mulf %171, %171 : vector<8x32xf32>
      %cst_86 = arith.constant dense<0.000000e+00> : vector<8xf32>
      %173 = vector.multi_reduction <add>, %172, %cst_86 [1] : vector<8x32xf32> to vector<8xf32>
      %174 = vector.shape_cast %173 : vector<8xf32> to vector<8x1xf32>
      %cst_87 = arith.constant 3.200000e+01 : f32
      %175 = vector.broadcast %cst_87 : f32 to vector<8x1xf32>
      %176 = arith.divf %174, %175 : vector<8x1xf32>
      %cst_88 = arith.constant 9.99999996E-13 : f32
      %177 = vector.broadcast %cst_88 : f32 to vector<8x1xf32>
      %178 = arith.addf %176, %177 : vector<8x1xf32>
      %179 = math.rsqrt %178 : vector<8x1xf32>
      %180 = vector.broadcast %179 : vector<8x1xf32> to vector<8x32xf32>
      %181 = arith.mulf %171, %180 : vector<8x32xf32>
      %182 = vector.broadcast %164 : vector<1x32xf32> to vector<8x32xf32>
      %183 = arith.mulf %181, %182 : vector<8x32xf32>
      %184 = vector.broadcast %165 : vector<1x32xf32> to vector<8x32xf32>
      %185 = arith.addf %183, %184 : vector<8x32xf32>
      %c0_89 = arith.constant 0 : index
      %c0_90 = arith.constant 0 : index
      %c0_91 = arith.constant 0 : index
      %186 = vector.load %arg21[%c0_89, %c0_90, %c0_91] : memref<1x8x32xf32, #tpu.memory_space<vmem>>, vector<1x8x32xf32>
      %187 = vector.shape_cast %186 : vector<1x8x32xf32> to vector<8x32xf32>
      %188 = vector.shape_cast %185 : vector<8x32xf32> to vector<1x8x32xf32>
      tpu.vector_store %arg21[%c0_89, %c0_90, %c0_91], %188 {strides = array<i32>} : memref<1x8x32xf32, #tpu.memory_space<vmem>>, vector<1x8x32xf32>,
    } else {
    }
    return
  }
  func.func @transform_0(%arg0: i32, %arg1: i32, %arg2: i32) -> (i32, i32, i32) {
    %c0_i32 = arith.constant 0 : i32
    %c0_i32_0 = arith.constant 0 : i32
    return %arg0, %arg1, %c0_i32 : i32, i32, i32
  }
  func.func @transform_1(%arg0: i32, %arg1: i32, %arg2: i32) -> (i32, i32, i32) {
    %c0_i32 = arith.constant 0 : i32
    %c0_i32_0 = arith.constant 0 : i32
    %c0_i32_1 = arith.constant 0 : i32
    return %arg0, %c0_i32, %c0_i32_0 : i32, i32, i32
  }
  func.func @transform_2(%arg0: i32, %arg1: i32, %arg2: i32) -> (i32, i32, i32) {
    %c0_i32 = arith.constant 0 : i32
    %c0_i32_0 = arith.constant 0 : i32
    %c0_i32_1 = arith.constant 0 : i32
    %c0_i32_2 = arith.constant 0 : i32
    return %c0_i32, %c0_i32_0, %c0_i32_1 : i32, i32, i32
  }
  func.func @transform_3(%arg0: i32, %arg1: i32, %arg2: i32) -> (i32, i32, i32) {
    %c0_i32 = arith.constant 0 : i32
    %c0_i32_0 = arith.constant 0 : i32
    %c0_i32_1 = arith.constant 0 : i32
    %c0_i32_2 = arith.constant 0 : i32
    return %c0_i32, %c0_i32_0, %c0_i32_1 : i32, i32, i32
  }
  func.func @transform_4(%arg0: i32, %arg1: i32, %arg2: i32) -> (i32, i32, i32) {
    %c0_i32 = arith.constant 0 : i32
    %c0_i32_0 = arith.constant 0 : i32
    %c0_i32_1 = arith.constant 0 : i32
    %c0_i32_2 = arith.constant 0 : i32
    return %c0_i32, %c0_i32_0, %c0_i32_1 : i32, i32, i32
  }
  func.func @transform_5(%arg0: i32, %arg1: i32, %arg2: i32) -> (i32, i32, i32) {
    %c0_i32 = arith.constant 0 : i32
    %c0_i32_0 = arith.constant 0 : i32
    %c0_i32_1 = arith.constant 0 : i32
    %c0_i32_2 = arith.constant 0 : i32
    return %c0_i32, %c0_i32_0, %c0_i32_1 : i32, i32, i32
  }
  func.func @transform_6(%arg0: i32, %arg1: i32, %arg2: i32) -> (i32, i32, i32) {
    %c0_i32 = arith.constant 0 : i32
    %c0_i32_0 = arith.constant 0 : i32
    %c0_i32_1 = arith.constant 0 : i32
    %c0_i32_2 = arith.constant 0 : i32
    return %c0_i32, %c0_i32_0, %c0_i32_1 : i32, i32, i32
  }
  func.func @transform_7(%arg0: i32, %arg1: i32, %arg2: i32) -> (i32, i32, i32) {
    %c0_i32 = arith.constant 0 : i32
    %c0_i32_0 = arith.constant 0 : i32
    %c0_i32_1 = arith.constant 0 : i32
    %c0_i32_2 = arith.constant 0 : i32
    return %c0_i32, %c0_i32_0, %c0_i32_1 : i32, i32, i32
  }
  func.func @transform_8(%arg0: i32, %arg1: i32, %arg2: i32) -> (i32, i32, i32) {
    %c0_i32 = arith.constant 0 : i32
    %c0_i32_0 = arith.constant 0 : i32
    %c0_i32_1 = arith.constant 0 : i32
    %c0_i32_2 = arith.constant 0 : i32
    return %c0_i32, %c0_i32_0, %c0_i32_1 : i32, i32, i32
  }
  func.func @transform_9(%arg0: i32, %arg1: i32, %arg2: i32) -> (i32, i32) {
    %c0_i32 = arith.constant 0 : i32
    %c0_i32_0 = arith.constant 0 : i32
    %c0_i32_1 = arith.constant 0 : i32
    return %c0_i32, %c0_i32_0 : i32, i32
  }
  func.func @transform_10(%arg0: i32, %arg1: i32, %arg2: i32) -> (i32, i32) {
    %c0_i32 = arith.constant 0 : i32
    %c0_i32_0 = arith.constant 0 : i32
    %c0_i32_1 = arith.constant 0 : i32
    return %c0_i32, %c0_i32_0 : i32, i32
  }
  func.func @transform_11(%arg0: i32, %arg1: i32, %arg2: i32) -> (i32, i32) {
    %c0_i32 = arith.constant 0 : i32
    %c0_i32_0 = arith.constant 0 : i32
    %c0_i32_1 = arith.constant 0 : i32
    return %c0_i32, %c0_i32_0 : i32, i32
  }
  func.func @transform_12(%arg0: i32, %arg1: i32, %arg2: i32) -> (i32, i32) {
    %c0_i32 = arith.constant 0 : i32
    %c0_i32_0 = arith.constant 0 : i32
    %c0_i32_1 = arith.constant 0 : i32
    return %c0_i32, %c0_i32_0 : i32, i32
  }
  func.func @transform_13(%arg0: i32, %arg1: i32, %arg2: i32) -> (i32, i32) {
    %c0_i32 = arith.constant 0 : i32
    %c0_i32_0 = arith.constant 0 : i32
    %c0_i32_1 = arith.constant 0 : i32
    return %c0_i32, %c0_i32_0 : i32, i32
  }
  func.func @transform_14(%arg0: i32, %arg1: i32, %arg2: i32) -> (i32, i32) {
    %c0_i32 = arith.constant 0 : i32
    %c0_i32_0 = arith.constant 0 : i32
    %c0_i32_1 = arith.constant 0 : i32
    return %c0_i32, %c0_i32_0 : i32, i32
  }
  func.func @transform_15(%arg0: i32, %arg1: i32, %arg2: i32) -> (i32, i32) {
    %c0_i32 = arith.constant 0 : i32
    %c0_i32_0 = arith.constant 0 : i32
    %c0_i32_1 = arith.constant 0 : i32
    return %c0_i32, %c0_i32_0 : i32, i32
  }
  func.func @transform_16(%arg0: i32, %arg1: i32, %arg2: i32) -> (i32, i32) {
    %c0_i32 = arith.constant 0 : i32
    %c0_i32_0 = arith.constant 0 : i32
    %c0_i32_1 = arith.constant 0 : i32
    return %c0_i32, %c0_i32_0 : i32, i32
  }
  func.func @transform_17(%arg0: i32, %arg1: i32, %arg2: i32) -> (i32, i32) {
    %c0_i32 = arith.constant 0 : i32
    %c0_i32_0 = arith.constant 0 : i32
    %c0_i32_1 = arith.constant 0 : i32
    return %c0_i32, %c0_i32_0 : i32, i32
  }
  func.func @transform_18(%arg0: i32, %arg1: i32, %arg2: i32) -> (i32, i32, i32) {
    %c0_i32 = arith.constant 0 : i32
    %c0_i32_0 = arith.constant 0 : i32
    return %arg0, %arg1, %c0_i32 : i32, i32, i32
  }
}

</mosaic_0001>

<bundles_post_ra>
// kernel: tpu_custom_call.1
= control target key start
LH: loop header
LB: loop body
LE: loop exit
PB: predicated region body
PF: predicated region fallthrough
CT: control target
= control target key end

     0   :  { %s2796_s0 = inlined_call_operand.vmem [shape: f32[2,8,32], index: 0, kind: input, shape index: {}]   ;;  %s2797_s1 = inlined_call_operand.hbm [shape: bf16[2,8,32], index: 1, kind: input, shape index: {}]   ;;  %s2798_s2 = inlined_call_operand.vmem [shape: bf16[1,32,32], index: 2, kind: input, shape index: {}]   ;;  %s2799_s3 = inlined_call_operand.vmem [shape: f32[1,1,32], index: 3, kind: input, shape index: {}]   ;;  %s2800_s4 = inlined_call_operand.vmem [shape: bf16[1,32,32], index: 4, kind: input, shape index: {}]   ;;  %s2801_s5 = inlined_call_operand.vmem [shape: f32[1,1,32], index: 5, kind: input, shape index: {}]   ;;  %s2802_s6 = inlined_call_operand.hbm [shape: bf16[1,32,32], index: 6, kind: input, shape index: {}]   ;;  %s2803_s7 = inlined_call_operand.vmem [shape: f32[1,1,32], index: 7, kind: input, shape index: {}]   ;;  %s2804_s8 = inlined_call_operand.hbm [shape: bf16[1,32,32], index: 8, kind: input, shape index: {}]   ;;  %s2805_s9 = inlined_call_operand.vmem [shape: f32[1,32], index: 9, kind: input, shape index: {}]   ;;  %s2806_s10 = inlined_call_operand.vmem [shape: f32[1,32], index: 10, kind: input, shape index: {}]   ;;  %s2807_s11 = inlined_call_operand.vmem [shape: f32[1,32], index: 11, kind: input, shape index: {}]   ;;  %s2808_s12 = inlined_call_operand.hbm [shape: bf16[32,64], index: 12, kind: input, shape index: {}]   ;;  %s2809_s13 = inlined_call_operand.vmem [shape: f32[1,64], index: 13, kind: input, shape index: {}]   ;;  %s2810_s14 = inlined_call_operand.vmem [shape: bf16[64,32], index: 14, kind: input, shape index: {}]   ;;  %s2811_s15 = inlined_call_operand.vmem [shape: f32[1,32], index: 15, kind: input, shape index: {}]   ;;  %s2812_s16 = inlined_call_operand.vmem [shape: f32[1,32], index: 16, kind: input, shape index: {}]   ;;  %s2813_s17 = inlined_call_operand.vmem [shape: f32[1,32], index: 17, kind: input, shape index: {}]   ;;  %s2814_s18 = inlined_call_operand.hbm [shape: f32[2,8,32], index: 18, kind: output, shape index: {}]  }
   0x1   :  { %2827 = sst [smem:[#allocation22_spill]] %s2796_s0 }
   0x2   :  { %2828 = sst [smem:[#allocation23_spill]] %s2797_s1 }
   0x3   :  { %2829 = sst [smem:[#allocation24_spill]] %s2798_s2 }
   0x4   :  { %2830 = sst [smem:[#allocation25_spill]] %s2802_s6 }
   0x5   :  { %2831 = sst [smem:[#allocation26_spill]] %s2804_s8 }
   0x6   :  { %2832 = sst [smem:[#allocation27_spill]] %s2808_s12 }
   0x7   :  { %2833 = sst [smem:[#allocation28_spill]] %s2809_s13 }
   0x8   :  { %2834 = sst [smem:[#allocation29_spill]] %s2811_s15 }
   0x9   :  { %2835 = sst [smem:[#allocation30_spill]] %s2812_s16 }
   0xa   :  { %2836 = sst [smem:[#allocation31_spill]] %s2813_s17 }
   0xb   :  { %2837 = sst [smem:[#allocation32_spill]] %s2814_s18 }
   0xc   :  { %23 = vsyncpa [#allocation6], 0 }
   0xd   :  { %25 = vsyncpa [#allocation6 + $0x1], 0 }
   0xe   :  { %26 = vsyncpa [#allocation9], 0 }
   0xf   :  { %27 = vsyncpa [#allocation12], 0 }
  0x10   :  { %28 = vsyncpa [#allocation7], 0 }
  0x11   :  { %30 = vsyncpa [#allocation7 + $0x1], 0  ;;  %s2448_s27 = smov 0   ;;  %s2450_s28 = smov 0  }
  0x12   :  { %s2452_s29 = smov 0   ;;  %s2454_s30 = smov 0  }
  0x13   :  { %s2456_s0 = smov 0   ;;  %s2458_s19 = smov 0  }
  0x14 LB: > { %2838 = sst [smem:[#allocation18_spill]] %s2316_s27  ;;  %s1811_s1 = sadd.s32 4294967295, %s2336_s19   ;;  %s2336_s19 = sphi %s2458_s19, %s36_s19   ;;  %s2332_s0 = sphi %s2456_s0, %s2874_s0   ;;  %s2328_s30 = sphi %s2454_s30, %s2873_s30   ;;  %s2324_s29 = sphi %s2452_s29, %s2872_s29   ;;  %s2320_s28 = sphi %s2450_s28, %s2871_s28   ;;  %s2316_s27 = sphi %s2448_s27, %s2870_s27  }
  0x15   : > { %s1812_s20 = sadd.s32 4294967294, %s2336_s19   ;;  %p103_p0 = scmp.ne.s32.totalorder %s2320_s28, %s2316_s27 }
  0x16   : > { %p2482_p1 = scmp.eq.s32.totalorder %s1811_s1, 0  ;;  %p2486_p2 = scmp.eq.s32.totalorder %s1811_s1, 1 }
  0x17   : > { %p471_p3 = scmp.eq.s32.totalorder %s1812_s20, 1  ;;  %p1813_p5 = scmp.ge.s32.totalorder %s2336_s19, 1 }
  0x18   : > { %s2839_s21 = scalar_select %p2482_p1, 1, 0 }
  0x19   : > { %p2492_p4 = por %p2482_p1, %p103_p0  ;;  %p2497_p6 = por %p471_p3, %p103_p0 }
  0x1a   : > { %p478_p7 = scmp.lt.s32.totalorder %s2336_s19, 3  ;;  %s2338_s25 = smov [#allocation8]  }
  0x1b   : > { %s2841_s2 = scalar_select %p2492_p4, 1, 0 }
  0x1c   : > { %s2842_s23 = scalar_select %p2497_p6, 1, 0 }
  0x1d   : > { %p2502_p8 = pnand %p1813_p5, %p478_p7  ;;  %s502_s26 = sshll.u32 %s2338_s25, 4  ;;  %s503_s26 = int_to_ptr.vmem [resolvable:$true] %s502_s26 }
  0x1e   : > { %2843 = sst [smem:[#allocation19_spill]] %s2842_s23  ;;  %s2339_s20 = smov [#allocation10]  }
  0x1f   : > { %s2844_s24 = scalar_select %p2502_p8, 1, 0 }
  0x20   : > { %p2021_p9 = pneg %p2502_p8  ;;  %s518_s23 = sshll.u32 %s2339_s20, 4  ;;  %s519_s23 = int_to_ptr.vmem [resolvable:$true] %s518_s23 }
  0x21   : > { %s2340_s27 = smov [#allocation11]   ;;  %s2153_s17 = scalar_lea.vmem %s503_s26, 256 }
  0x22   : > { %p2511_p11 = pnand %p2021_p9, %p2482_p1  ;;  %s540_s18 = sshll.u32 %s2340_s27, 4  ;;  %s541_s18 = int_to_ptr.vmem [resolvable:$true] %s540_s18 }
  0x23   : > { %p2154_p13 = scmp.ne.s32.totalorder %s503_s26, %s2153_s17  ;;  %p2161_p5 = scmp.lt.s32.totalorder %s503_s26, %s503_s26 }
  0x24   : > { %p2144_p12 = pneg %p2511_p11  ;;  %p2162_p7 = scmp.lt.s32.totalorder %s2153_s17, %s2153_s17 }
  0x26   : > { %p2156_p0 = pnand %p2154_p13, %p2144_p12  ;;  %p2163_p9 = por %p2162_p7, %p2161_p5 }
  0x28   : > { %p2157_p3 = pneg %p2156_p0 }
  0x2a   : > { %p2164_p10 = pnand %p2163_p9, %p2157_p3 }
  0x2c   : > { %2167 = shalt.err (!%p2164_p10)
}
  0x2d   : > { %s2341_s25 = smov 64   ;;  %s2342_s20 = smov 4  }
  0x2e   : > { %s2846_s6 = sld [smem:[#allocation25_spill]]  ;;  %s2179_s15 = scalar_lea.vmem %s519_s23, 256 }
  0x2f   : > { %p2180_p6 = scmp.ne.s32.totalorder %s519_s23, %s2179_s15  ;;  %p2187_p1 = scmp.lt.s32.totalorder %s519_s23, %s519_s23 }
  0x30   : > { %p2188_p4 = scmp.lt.s32.totalorder %s2179_s15, %s2179_s15 }
  0x31   : > { %p2182_p13 = pnand %p2180_p6, %p2144_p12 }
  0x32   : > { %p2189_p5 = por %p2188_p4, %p2187_p1 }
  0x33   : > { %p2183_p0 = pneg %p2182_p13 }
  0x34   : > { %2024 = dma.hbm_to_vmem [thread:$0]  (!%p2511_p11), %s2846_s6, 256, %s503_s26, [#allocation9], %s2341_s25, %s2341_s25, %s2342_s20  }
  0x35   : > { %p2190_p3 = pnand %p2189_p5, %p2183_p0 }
  0x37   : > { %2193 = shalt.err (!%p2190_p3)
}
  0x38   : > { %s2847_s8 = sld [smem:[#allocation26_spill]]  ;;  %s2205_s16 = scalar_lea.vmem %s541_s18, 256 }
  0x39   : > { %p2206_p10 = scmp.ne.s32.totalorder %s541_s18, %s2205_s16  ;;  %p2213_p9 = scmp.lt.s32.totalorder %s541_s18, %s541_s18 }
  0x3a   : > { %p2214_p13 = scmp.lt.s32.totalorder %s2205_s16, %s2205_s16 }
  0x3b   : > { %p2208_p7 = pnand %p2206_p10, %p2144_p12 }
  0x3c   : > { %p2215_p8 = por %p2214_p13, %p2213_p9 }
  0x3d   : > { %p2209_p6 = pneg %p2208_p7 }
  0x3e   : > { %2027 = dma.hbm_to_vmem [thread:$0]  (!%p2511_p11), %s2847_s8, 256, %s519_s23, [#allocation9], %s2341_s25, %s2341_s25, %s2342_s20  }
  0x3f   : > { %p2216_p1 = pnand %p2215_p8, %p2209_p6 }
  0x41   : > { %2219 = shalt.err (!%p2216_p1)
}
  0x42   : > { %s2848_s12 = sld [smem:[#allocation27_spill]]  ;;  %s90_s13 = sadd.s32 1, %s2324_s29 }
  0x43   : > { %s55_s23 = sadd.s32 1, %s2332_s0  ;;  %p97_p4 = scmp.ne.s32.totalorder %s2324_s29, %s2320_s28 }
  0x44   : > { %p57_p8 = scmp.ge.s32.totalorder %s55_s23, 2  ;;  %p98_p12 = scmp.eq.s32.totalorder %s2336_s19, 0 }
  0x45   : > { %p2548_p0 = por %p2486_p2, %p97_p4  ;;  %p2042_p5 = scmp.lt.s32.totalorder %s2336_s19, 2 }
  0x46   : > { %s2876_s23 = smov (%p57_p8, %s55_s23), 0  ;;  %p99_p3 = por %p98_p12, %p97_p4 }
  0x47   : > { %s2849_s1 = scalar_select %p2548_p0, 1, 0 }
  0x48   : > { %2030 = dma.hbm_to_vmem [thread:$0]  (!%p2511_p11), %s2848_s12, 256, %s541_s18, [#allocation12], %s2341_s25, %s2341_s25, %s2342_s20  }
  0x49   : > { %2850 = sst [smem:[#allocation20_spill]] %s2849_s1  ;;  %s579_s27 = sand.u32 1, %s2324_s29  }
  0x4a   : > { %2851 = sst [smem:[#allocation21_spill]] %s2876_s23  ;;  %s87_s17 = ssub.s32 %s2332_s0, %s2876_s23 }
  0x4b   : > { %p88_p10 = scmp.eq.s32.totalorder %s87_s17, 0  ;;  %s1818_s18 = sshll.u32 %s579_s27, 2 }
  0x4c   : > { %s1819_s25 = sshll.u32 %s2332_s0, 6  ;;  %s2852_s26 = sld [smem:[#allocation23_spill]] }
  0x4d   : > { %s2560_s20 = scalar_select %p88_p10, %s2324_s29, %s90_s13  }
  0x4e   : > { %s583_s6 = scalar_lea.vmem [#allocation5], %s1818_s18  ;;  %p2567_p2 = pnand %p2042_p5, %p99_p3 }
  0x4f   : > { %s590_s8 = sshll.u32 %s583_s6, 4  ;;  %s580_s1 = scalar_lea.sflag [#allocation6], %s579_s27  ;;  %s591_s8 = int_to_ptr.vmem [resolvable:$true] %s590_s8 }
  0x50   : > { %p2222_p11 = pneg %p2567_p2  ;;  %s2233_s17 = scalar_lea.vmem %s591_s8, 64 }
  0x51   : > { %p2234_p7 = scmp.ne.s32.totalorder %s591_s8, %s2233_s17  ;;  %s2343_s13 = smov [#allocation5]  }
  0x52   : > { %s588_s22 = scalar_lea.hbm %s2852_s26, %s1819_s25  ;;  %s2238_s23 = sshll.u32 %s2343_s13, 4  ;;  %s2239_s23 = int_to_ptr.vmem [resolvable:$false] %s2238_s23 }
  0x53   : > { %p2236_p6 = pnand %p2234_p7, %p2222_p11  ;;  %s2240_s25 = scalar_lea.vmem %s2239_s23, 128 }
  0x54   : > { %p2241_p13 = scmp.lt.s32.totalorder %s591_s8, %s2239_s23  ;;  %p2242_p1 = scmp.lt.s32.totalorder %s2240_s25, %s2233_s17 }
  0x55   : > { %p2237_p9 = pneg %p2236_p6 }
  0x56   : > { %p2243_p4 = por %p2242_p1, %p2241_p13 }
  0x58   : > { %p2244_p8 = pnand %p2243_p4, %p2237_p9 }
  0x5a   : > { %2247 = shalt.err (!%p2244_p8)
}
  0x5b   : > { %2034 = dma.hbm_to_vmem [thread:$0]  (!%p2567_p2), %s588_s22, 64, %s591_s8, %s580_s1  }
  0x5c   : > { %p2854_p12 = scmp.ne.s32.totalorder %s2844_s24, 0 }
  0x5d   : > { %s2578_s6 = sand.u32 (!%p2854_p12), 1, %s2320_s28   ;;  %p2855_p5 = scmp.ne.s32.totalorder (!%p2854_p12), %s2841_s2, 0 }
  0x5e   : > { %599 = sbr.rel (%p2854_p12) target bundleno = 2517 (0x9d5), region = 92  ;;  %s1821_s27 = sshll.u32 (!%p2854_p12), %s2578_s6, 2 }
  0x5f   : > { %s602_s18 = scalar_lea.sflag (!%p2854_p12), [#allocation6], %s2578_s6  ;;  %s605_s16 = scalar_lea.vmem (!%p2854_p12), [#allocation5], %s1821_s27 }
  0x63   : > { %2299 = dma.done.wait (%p2855_p5), %s602_s18, 64  }
  0x64   : > { %2301 = vsyncadd (%p2855_p5), %s602_s18, 4294967232  ;;  %p2856_p3 = scmp.ne.s32.totalorder %s2839_s21, 0 }
  0x66   : > { %2303 = dma.done.wait (%p2856_p3), [#allocation9], 512  }
  0x67   : > { %2305 = vsyncadd (%p2856_p3), [#allocation9], 4294966784 }
  0x68   : > { %2307 = dma.done.wait (%p2856_p3), [#allocation12], 256  }
  0x69   : > { %2309 = vsyncadd (%p2856_p3), [#allocation12], 4294967040  ;;  %vm689_vm0 = vcmask 261120   ;;  %p677_p10 = scmp.lt.s32.totalorder %s2328_s30, 1  ;;  %v2344_v0 = vmov 0.0   ;;  %vm2345_vm1 = vmmov 0  }
  0x6a   : > { %1913 = vmatprep.subr.bf16.mxu1 %v2344_v0  ;;  %1905 = vmatprep.subr.bf16.mxu0 %v2344_v0  ;;  %690 = vst.msk [vmem:[#allocation2] sm:$0xff] %vm689_vm0, %v2344_v0  ;;  %v2108_v1 = vld [vmem:[%s2800_s4 + $0x8] sm:$0xff]   ;;  %s2857_s1 = sld [smem:[#allocation24_spill]]  ;;  %v2110_v3 = vld [vmem:[%s2800_s4] sm:$0xff]   ;;  %v696_v5 = vld [vmem:[%s605_s16] sm:$0xf] }
  0x6b   : > { %1917 = vmatprep.mubr.msk.bf16.mxu1 %vm2345_vm1, %v2344_v0  ;;  %1909 = vmatprep.mubr.msk.bf16.mxu0 %vm2345_vm1, %v2344_v0  ;;  %s678_s8 = scalar_select %p677_p10, %s2328_s30, 1  ;;  %vm693_vm2 = vcmask 257024   ;;  %v1831_v9 = vld [vmem:[%s2801_s5] ss:$0 sm:$0xff]  ;;  %vm907_vm3 = vcmask 64512   ;;  %v2112_v25 = vld [vmem:[#allocation8 + $0x8] sm:$0xff]  }
  0x6c   : > { %s2858_s22 = sld [smem:[#allocation22_spill]]  ;;  %1914 = vmatpush3.bf16.msra.mxu1 %v2108_v1  ;;  %v1827_v14 = vld [vmem:[%s2799_s3] ss:$0 sm:$0xff]  ;;  %s2346_s2 = smov 112   ;;  %vm969_vm4 = vcmask 1043456   ;;  %vm1131_vm5 = vcmask 130112  }
  0x6d   : > { %s1826_s12 = sshll.u32 %s678_s8, 3  ;;  %1915 = vmatprep.subr.bf16.mxu1 %v2344_v0  ;;  %s2347_s24 = smov 120   ;;  %v2113_v26 = vld [vmem:[#allocation8] sm:$0xff]   ;;  %vm1247_vm6 = vcmask 195712   ;;  %vm1363_vm7 = vcmask 261312   ;;  %vm1584_vm8 = vcmask 523264  }
  0x6e   : > { %s2348_s23 = smov 104   ;;  %v1835_v41 = vld [vmem:[%s2803_s7] ss:$0 sm:$0xff]  ;;  %s2351_s13 = smov 24  }
  0x6f   : > { %s2859_s27 = sld [smem:[#allocation28_spill]] }
  0x70   : > { %v2109_v2 = vld [vmem:[%s2857_s1 + $0x8] sm:$0xff]   ;;  %v2111_v4 = vld [vmem:[%s2857_s1] sm:$0xff]   ;;  %1916 = vmatpush3.bf16.msra.mxu1 %v2110_v3  ;;  %s2860_s8 = sld [smem:[#allocation29_spill]]  ;;  %s1660_s1 = scalar_lea.sflag [#allocation7], %s2578_s6 }
  0x71   : > { %1906 = vmatpush3.bf16.msra.mxu0 %v2109_v2  ;;  %1929 = vmatprep.subr.bf16.mxu1 %v2344_v0  ;;  %s2864_s16 = sld [smem:[#allocation32_spill]] }
  0x72   : > { %s683_s17 = scalar_lea.vmem %s2858_s22, %s1826_s12  ;;  %1907 = vmatprep.subr.bf16.mxu0 %v2344_v0  ;;  %s2349_s22 = smov 8  }
  0x73   : > { %v2621_v6 = vld [vmem:[%s683_s17] sm:$0xff]  ;;  %1918 = vmatmul.mubr.msk.bf16.vlgmr.msra.gmra.mxu1 %vm689_vm0, %v696_v5  ;;  %s2350_s17 = smov 16   ;;  %s1825_s12 = sshll.u32 %s2578_s6, 3 }
  0x74   : > { %v692_v7 = vpack.c.bf16 %v2621_v6, %v2621_v6  ;;  %1931 = vmatprep.mubr.msk.bf16.mxu1 %vm2345_vm1, %v2344_v0 }
  0x75   : > { %1908 = vmatpush3.bf16.msra.mxu0 %v2111_v4 }
  0x76   : > { %694 = vst.msk [vmem:[#allocation3] sm:$0xf] %vm693_vm2, %v692_v7  ;;  %1921 = vmatprep.subr.bf16.mxu0 %v2344_v0 }
  0x7d   : > { %v695_v8 = vld [vmem:[#allocation3] sm:$0xf] }
  0x7e   : > { %1910 = vmatmul.mubr.msk.bf16.vlgmr.msra.gmra.mxu0 %vm689_vm0, %v695_v8 }
  0x7f   : > { %1925 = vmatprep.mubr.msk.bf16.mxu0 %vm2345_vm1, %v2344_v0  ;;  %1922 = vmatpush3.bf16.msra.mxu0 %v2112_v25 }
  0x80   : > { %1923 = vmatprep.subr.bf16.mxu0 %v2344_v0 }
  0x83   : > { %1924 = vmatpush3.bf16.msra.mxu0 %v2113_v26 }
  0x84   : > { %1935 = vmatprep.subr.bf16.mxu0 %v2344_v0 }
  0x86   : > { %1926 = vmatmul.mubr.msk.bf16.vlgmr.msra.gmra.mxu0 %vm689_vm0, %v696_v5 }
  0x87   : > { %1937 = vmatprep.mubr.msk.bf16.mxu0 %vm2345_vm1, %v2344_v0 }
 0x133   : > { %v831_v10 = vpop.f32.mrf.mxu1 }
 0x134   : > { %v832_v11 = vadd.f32 %v1831_v9, %v831_v10 }
 0x135   : > { %v1919_v12 = vpop.f32.mrf.mxu1 }
 0x136   : > { %v905_v13 = vpack.c.bf16 %v832_v11, %v832_v11 }
 0x137   : > { %v834_v15 = vpop.f32.mrf.mxu1 }
 0x138   : > { %1135 = vrot.lane.b32.xlu1 %v905_v13, %s2346_s2  ;;  %1018 = vrot.lane.b32.xlu0 %v905_v13, %s2347_s24  ;;  %v912_v16 = vsel %vm907_vm3, %v905_v13, 0 }
 0x139   : > { %v1920_v18 = vpop.f32.mrf.mxu1  ;;  %1930 = vmatpush3.bf16.xpose.msra.mxu1 %v912_v16 }
 0x13a   : > { %1941 = vmatprep.subr.bf16.mxu1 %v2344_v0 }
 0x13e   : > { %v762_v17 = vpop.f32.mrf.mxu0 }
 0x13f   : > { %v763_v19 = vadd.f32 %v1827_v14, %v762_v17 }
 0x140   : > { %v1911_v20 = vpop.f32.mrf.mxu0 }
 0x141   : > { %v903_v21 = vmul.f32 0.35355338, %v763_v19 }
 0x142   : > { %v765_v22 = vpop.f32.mrf.mxu0 }
 0x143   : > { %v904_v23 = vpack.c.bf16 %v903_v21, %v903_v21 }
 0x144   : > { %v1912_v24 = vpop.f32.mrf.mxu0 }
 0x145   : > { %1133 = vrot.lane.b32.xlu1 %v904_v23, %s2346_s2  ;;  %1015 = vrot.lane.b32.xlu0 %v904_v23, %s2347_s24 }
 0x146   : > { %1932 = vmatmul.mubr.msk.bf16.vlgmr.msra.gmra.mxu1 %vm907_vm3, %v904_v23  ;;  %v897_v42 = vpop.f32.mrf.mxu0 }
 0x147   : > { %1943 = vmatprep.mubr.msk.bf16.mxu1 %vm2345_vm1, %v2344_v0  ;;  %v898_v43 = vadd.f32 %v1835_v41, %v897_v42 }
 0x148   : > { %v1927_v44 = vpop.f32.mrf.mxu0 }
 0x149   : > { %1249 = vrot.lane.b32.xlu1 %v904_v23, %s2348_s23  ;;  %1251 = vrot.lane.b32.xlu0 %v905_v13, %s2348_s23  ;;  %v906_v45 = vpack.c.bf16 %v898_v43, %v898_v43 }
 0x14a   : > { %v900_v46 = vpop.f32.mrf.mxu0 }
 0x14b   : > { %v971_v47 = vsel %vm969_vm4, %v906_v45, 0 }
 0x14c   : > { %v1928_v48 = vpop.f32.mrf.mxu0  ;;  %1936 = vmatpush3.bf16.msra.mxu0 %v971_v47 }
 0x14d   : > { %1947 = vmatprep.subr.bf16.mxu0 %v2344_v0 }
 0x1aa   : > { %v1019_v27 = vpop.permute.xlu0 %1018  ;;  %v1136_v29 = vpop.permute.xlu1 %1135 }
 0x1ab   : > { %v1024_v28 = vsel %vm907_vm3, %v1019_v27, 0  ;;  %v1141_v31 = vsel %vm907_vm3, %v1136_v29, 0 }
 0x1ac   : > { %1942 = vmatpush3.bf16.xpose.msra.mxu1 %v1024_v28 }
 0x1ad   : > { %1953 = vmatprep.subr.bf16.mxu1 %v2344_v0 }
 0x1b7   : > { %v1016_v30 = vpop.permute.xlu0 %1015  ;;  %v1134_v33 = vpop.permute.xlu1 %1133 }
 0x1b8   : > { %1944 = vmatmul.mubr.msk.bf16.vlgmr.msra.gmra.mxu1 %vm907_vm3, %v1016_v30 }
 0x1b9   : > { %1954 = vmatpush3.bf16.xpose.msra.mxu1 %v1141_v31  ;;  %1955 = vmatprep.mubr.msk.bf16.mxu1 %vm2345_vm1, %v2344_v0 }
 0x1ba   : > { %1965 = vmatprep.subr.bf16.mxu1 %v2344_v0 }
 0x1bb   : > { %v1252_v32 = vpop.permute.xlu0 %1251  ;;  %v1250_v35 = vpop.permute.xlu1 %1249 }
 0x1bc   : > { %v1257_v34 = vsel %vm907_vm3, %v1252_v32, 0 }
 0x1c0   : > { %1956 = vmatmul.mubr.msk.bf16.vlgmr.msra.gmra.mxu1 %vm907_vm3, %v1134_v33 }
 0x1c1   : > { %1966 = vmatpush3.bf16.xpose.msra.mxu1 %v1257_v34  ;;  %1967 = vmatprep.mubr.msk.bf16.mxu1 %vm2345_vm1, %v2344_v0 }
 0x1c2   : > { %1977 = vmatprep.subr.bf16.mxu1 %v2344_v0 }
 0x1c8   : > { %1968 = vmatmul.mubr.msk.bf16.vlgmr.msra.gmra.mxu1 %vm907_vm3, %v1250_v35 }
 0x1c9   : > { %1981 = vmatprep.mubr.msk.bf16.mxu1 %vm2345_vm1, %v2344_v0 }
 0x206   : > { %v948_v36 = vpop.f32.mrf.mxu1 }
 0x207   : > { %v954_v37 = vsel %vm907_vm3, %v948_v36, -inf }
 0x208   : > { %955 = vmax.xlane.f32.xlu0 %v954_v37  ;;  %v1933_v38 = vpop.f32.mrf.mxu1 }
 0x20a   : > { %v951_v39 = vpop.f32.mrf.mxu1 }
 0x20c   : > { %v1934_v40 = vpop.f32.mrf.mxu1 }
 0x278   : > { %v1060_v49 = vpop.f32.mrf.mxu1 }
 0x279   : > { %v1066_v50 = vsel %vm907_vm3, %v1060_v49, -inf }
 0x27a   : > { %1067 = vmax.xlane.f32.xlu1 %v1066_v50  ;;  %v1945_v51 = vpop.f32.mrf.mxu1 }
 0x27b   : > { %v2114_v51 = vld [vmem:[#allocation10 + $0x8] sm:$0xff]  }
 0x27c   : > { %v1063_v52 = vpop.f32.mrf.mxu1  ;;  %1978 = vmatpush3.bf16.msra.mxu1 %v2114_v51 }
 0x27d   : > { %1979 = vmatprep.subr.bf16.mxu1 %v2344_v0 }
 0x27e   : > { %v1946_v53 = vpop.f32.mrf.mxu1 }
 0x27f   : > { %v2115_v53 = vld [vmem:[#allocation10] sm:$0xff]  }
 0x280   : > { %v1177_v54 = vpop.f32.mrf.mxu1  ;;  %1980 = vmatpush3.bf16.msra.mxu1 %v2115_v53 }
 0x281   : > { %v1183_v55 = vsel %vm907_vm3, %v1177_v54, -inf  ;;  %1993 = vmatprep.subr.bf16.mxu1 %v2344_v0 }
 0x282   : > { %1184 = vmax.xlane.f32.xlu0 %v1183_v55  ;;  %v1957_v56 = vpop.f32.mrf.mxu1 }
 0x284   : > { %v1180_v57 = vpop.f32.mrf.mxu1 }
 0x286   : > { %v1958_v58 = vpop.f32.mrf.mxu1 }
 0x288   : > { %v1293_v59 = vpop.f32.mrf.mxu1 }
 0x289   : > { %v1299_v60 = vsel %vm907_vm3, %v1293_v59, -inf }
 0x28a   : > { %1300 = vmax.xlane.f32.xlu0 %v1299_v60  ;;  %v1969_v61 = vpop.f32.mrf.mxu1 }
 0x28c   : > { %v1296_v62 = vpop.f32.mrf.mxu1 }
 0x28e   : > { %v1970_v63 = vpop.f32.mrf.mxu1 }
 0x291   : > { %v956_v1 = vpop.xlane.xlu0 %955 }
 0x292   : > { %v957_v2 = vsub.f32 %v948_v36, %v956_v1 }
 0x294   : > { %v958_v3 = vmul.f32 1.442695, %v957_v2 }
 0x296   : > { %2122 = vpow2.f32 %v958_v3 }
 0x2a3   : > { %v2123_v4 = vpop.eup %2122 }
 0x2a4   : > { %v960_v5 = vsel %vm907_vm3, %v2123_v4, 0.0 }
 0x2a5   : > { %961 = vadd.xlane.f32.xlu1 %v960_v5 }
 0x2b6   : > { %1079 = vrot.lane.b32.xlu1 %v906_v45, %s2347_s24  ;;  %s2352_s24 = smov [#allocation13]  }
 0x303   : > { %v1068_v7 = vpop.xlane.xlu1 %1067 }
 0x304   : > { %v1069_v8 = vsub.f32 %v1060_v49, %v1068_v7 }
 0x306   : > { %v1070_v9 = vmul.f32 1.442695, %v1069_v8 }
 0x308   : > { %2124 = vpow2.f32 %v1070_v9 }
 0x30b   : > { %v1185_v10 = vpop.xlane.xlu0 %1184 }
 0x30c   : > { %v1186_v11 = vsub.f32 %v1177_v54, %v1185_v10 }
 0x30e   : > { %v1187_v12 = vmul.f32 1.442695, %v1186_v11  ;;  %v1850_v11 = vld [vmem:[%s2805_s9] ss:$0 sm:$0xff] }
 0x310   : > { %2126 = vpow2.f32 %v1187_v12 }
 0x313   : > { %v1301_v13 = vpop.xlane.xlu0 %1300 }
 0x314   : > { %v1302_v14 = vsub.f32 %v1293_v59, %v1301_v13 }
 0x315   : > { %v2125_v15 = vpop.eup %2124 }
 0x316   : > { %v1303_v16 = vmul.f32 1.442695, %v1302_v14  ;;  %v1072_v17 = vsel %vm907_vm3, %v2125_v15, 0.0 }
 0x317   : > { %1073 = vadd.xlane.f32.xlu0 %v1072_v17 }
 0x318   : > { %2128 = vpow2.f32 %v1303_v16 }
 0x31d   : > { %v2127_v18 = vpop.eup %2126 }
 0x31e   : > { %v1189_v19 = vsel %vm907_vm3, %v2127_v18, 0.0 }
 0x31f   : > { %1190 = vadd.xlane.f32.xlu1 %v1189_v19 }
 0x325   : > { %v2129_v20 = vpop.eup %2128 }
 0x326   : > { %v1305_v21 = vsel %vm907_vm3, %v2129_v20, 0.0 }
 0x327   : > { %1306 = vadd.xlane.f32.xlu0 %v1305_v21 }
 0x32e   : > { %v962_v22 = vpop.xlane.xlu1 %961 }
 0x32f   : > { %2130 = vrcp.f32 %v962_v22  ;;  %v2116_v22 = vld [vmem:[#allocation11 + $0x8] sm:$0xff]  }
 0x330   : > { %1311 = vrot.lane.b32.xlu1 %v906_v45, %s2348_s23  ;;  %s2862_s23 = sld [smem:[#allocation30_spill]] }
 0x332   : > { %v1080_v24 = vpop.permute.xlu1 %1079 }
 0x333   : > { %v1085_v27 = vsel %vm969_vm4, %v1080_v24, 0  ;;  %v2119_v24 = vld [vmem:[%s2810_s14 + $0x10] sm:$0xff]  }
 0x33c   : > { %v2131_v23 = vpop.eup %2130 }
 0x33d   : > { %1195 = vrot.lane.b32.xlu0 %v906_v45, %s2346_s2  ;;  %v964_v25 = vmul.f32 %v2131_v23, %v2123_v4  ;;  %v1365_v4 = vld [vmem:[#allocation2] sm:$0xff] }
 0x33e   : > { %v2117_v23 = vld [vmem:[#allocation11] sm:$0xff]  }
 0x33f   : > { %v965_v26 = vpack.c.bf16 %v964_v25, %v964_v25 }
 0x341   : > { %1938 = vmatmul.mubr.msk.bf16.vlgmr.msra.gmra.mxu0 %vm907_vm3, %v965_v26 }
 0x342   : > { %1948 = vmatpush3.bf16.msra.mxu0 %v1085_v27  ;;  %1949 = vmatprep.mubr.msk.bf16.mxu0 %vm2345_vm1, %v2344_v0 }
 0x343   : > { %1959 = vmatprep.subr.bf16.mxu0 %v2344_v0 }
 0x3a0   : > { %v1074_v28 = vpop.xlane.xlu0 %1073 }
 0x3a1   : > { %2132 = vrcp.f32 %v1074_v28 }
 0x3a8   : > { %v1191_v29 = vpop.xlane.xlu1 %1190 }
 0x3a9   : > { %2134 = vrcp.f32 %v1191_v29  ;;  %v1851_v29 = vld [vmem:[%s2806_s10] ss:$0 sm:$0xff] }
 0x3ac   : > { %v1312_v38 = vpop.permute.xlu1 %1311 }
 0x3ad   : > { %v1317_v40 = vsel %vm969_vm4, %v1312_v38, 0 }
 0x3ae   : > { %v2133_v30 = vpop.eup %2132 }
 0x3af   : > { %v1076_v31 = vmul.f32 %v2133_v30, %v2125_v15 }
 0x3b0   : > { %v1307_v32 = vpop.xlane.xlu0 %1306 }
 0x3b1   : > { %2136 = vrcp.f32 %v1307_v32  ;;  %v1077_v33 = vpack.c.bf16 %v1076_v31, %v1076_v31  ;;  %v1852_v31 = vld [vmem:[%s2807_s11] ss:$0 sm:$0xff] }
 0x3b3   : > { %1950 = vmatmul.mubr.msk.bf16.vlgmr.msra.gmra.mxu0 %vm907_vm3, %v1077_v33 }
 0x3b4   : > { %v1196_v34 = vpop.permute.xlu0 %1195  ;;  %1961 = vmatprep.mubr.msk.bf16.mxu0 %vm2345_vm1, %v2344_v0 }
 0x3b5   : > { %v1201_v35 = vsel %vm969_vm4, %v1196_v34, 0 }
 0x3b6   : > { %v2135_v36 = vpop.eup %2134  ;;  %1960 = vmatpush3.bf16.msra.mxu0 %v1201_v35  ;;  %v2120_v35 = vld [vmem:[%s2810_s14 + $0x8] sm:$0xff]  }
 0x3b7   : > { %1971 = vmatprep.subr.bf16.mxu0 %v2344_v0  ;;  %v1193_v37 = vmul.f32 %v2135_v36, %v2127_v18  ;;  %v2121_v36 = vld [vmem:[%s2810_s14] sm:$0xff]  }
 0x3b9   : > { %v1194_v39 = vpack.c.bf16 %v1193_v37, %v1193_v37  ;;  %v1853_v37 = vld [vmem:[%s2859_s27] ss:$0 sm:$0xff] }
 0x3bb   : > { %1962 = vmatmul.mubr.msk.bf16.vlgmr.msra.gmra.mxu0 %vm907_vm3, %v1194_v39 }
 0x3bc   : > { %1972 = vmatpush3.bf16.msra.mxu0 %v1317_v40  ;;  %1973 = vmatprep.mubr.msk.bf16.mxu0 %vm2345_vm1, %v2344_v0 }
 0x3bd   : > { %1985 = vmatprep.subr.bf16.mxu0 %v2344_v0 }
 0x3be   : > { %v2137_v41 = vpop.eup %2136 }
 0x3bf   : > { %v1309_v42 = vmul.f32 %v2137_v41, %v2129_v20 }
 0x3c1   : > { %v1310_v43 = vpack.c.bf16 %v1309_v42, %v1309_v42 }
 0x3c3   : > { %1974 = vmatmul.mubr.msk.bf16.vlgmr.msra.gmra.mxu0 %vm907_vm3, %v1310_v43 }
 0x3c4   : > { %1989 = vmatprep.mubr.msk.bf16.mxu0 %vm2345_vm1, %v2344_v0  ;;  %1986 = vmatpush3.bf16.msra.mxu0 %v2116_v22 }
 0x3c5   : > { %1987 = vmatprep.subr.bf16.mxu0 %v2344_v0 }
 0x3c8   : > { %1988 = vmatpush3.bf16.msra.mxu0 %v2117_v23 }
 0x401   : > { %v1007_v44 = vpop.f32.mrf.mxu0 }
 0x402   : > { %1013 = vst.msk [vmem:[#allocation4] sm:$0xff] %vm907_vm3, %v1007_v44 }
 0x403   : > { %v1939_v45 = vpop.f32.mrf.mxu0 }
 0x405   : > { %v1010_v46 = vpop.f32.mrf.mxu0 }
 0x407   : > { %v1940_v47 = vpop.f32.mrf.mxu0 }
 0x473   : > { %v1121_v48 = vpop.f32.mrf.mxu0 }
 0x474   : > { %1128 = vrot.lane.b32.xlu1 %v1121_v48, %s2349_s22  ;;  %s2863_s22 = sld [smem:[#allocation31_spill]] }
 0x475   : > { %v1951_v49 = vpop.f32.mrf.mxu0 }
 0x477   : > { %v1124_v50 = vpop.f32.mrf.mxu0 }
 0x479   : > { %v1952_v52 = vpop.f32.mrf.mxu0 }
 0x47b   : > { %v1237_v54 = vpop.f32.mrf.mxu0 }
 0x47c   : > { %1244 = vrot.lane.b32.xlu0 %v1237_v54, %s2350_s17  ;;  %s1866_s17 = sshll.u32 %s2328_s30, 7 }
 0x47d   : > { %v1963_v55 = vpop.f32.mrf.mxu0 }
 0x47f   : > { %v1240_v56 = vpop.f32.mrf.mxu0 }
 0x481   : > { %v1964_v57 = vpop.f32.mrf.mxu0 }
 0x483   : > { %v1353_v58 = vpop.f32.mrf.mxu0 }
 0x484   : > { %1360 = vrot.lane.b32.xlu1 %v1353_v58, %s2351_s13  ;;  %s676_s13 = scalar_lea.vmem [#allocation13], %s1825_s12 }
 0x485   : > { %v1975_v59 = vpop.f32.mrf.mxu0  ;;  %s1674_s25 = sshll.u32 %s676_s13, 4  ;;  %s1675_s25 = int_to_ptr.vmem [resolvable:$true] %s1674_s25 }
 0x486   : > { %s2248_s2 = scalar_lea.vmem %s1675_s25, 128 }
 0x487   : > { %v1356_v60 = vpop.f32.mrf.mxu0  ;;  %p2249_p2 = scmp.ne.s32.totalorder %s1675_s25, %s2248_s2 }
 0x489   : > { %v1976_v61 = vpop.f32.mrf.mxu0  ;;  %p2250_p11 = pnand %p2249_p2, %p2548_p0 }
 0x48a   : > { %v1863_v61 = vld [vmem:[%s2862_s23] ss:$0 sm:$0xff]  ;;  %s2252_s23 = sshll.u32 %s2352_s24, 4  ;;  %s2253_s23 = int_to_ptr.vmem [resolvable:$false] %s2252_s23 }
 0x48b   : > { %p2251_p7 = pneg %p2250_p11  ;;  %s2254_s30 = scalar_lea.vmem %s2253_s23, 256 }
 0x48c   : > { %p2255_p6 = scmp.lt.s32.totalorder %s1675_s25, %s2253_s23  ;;  %p2256_p9 = scmp.lt.s32.totalorder %s2254_s30, %s2248_s2 }
 0x48e   : > { %p2257_p13 = por %p2256_p9, %p2255_p6 }
 0x490   : > { %p2258_p1 = pnand %p2257_p13, %p2251_p7 }
 0x4e6   : > { %v1129_v62 = vpop.permute.xlu1 %1128 }
 0x4e7   : > { %1132 = vst.msk [vmem:[#allocation4] sm:$0xff] %vm1131_vm5, %v1129_v62 }
 0x4ee   : > { %v1245_v63 = vpop.permute.xlu0 %1244 }
 0x4ef   : > { %1248 = vst.msk [vmem:[#allocation4] sm:$0xff] %vm1247_vm6, %v1245_v63  ;;  %v1864_v63 = vld [vmem:[%s2863_s22] ss:$0 sm:$0xff] }
 0x4f6   : > { %v1361_v1 = vpop.permute.xlu1 %1360 }
 0x4f7   : > { %1364 = vst.msk [vmem:[#allocation4] sm:$0xff] %vm1363_vm7, %v1361_v1 }
 0x4fe   : > { %v1366_v2 = vld [vmem:[#allocation4] sm:$0xff] }
 0x4ff   : > { %v1367_v3 = vpack.c.bf16 %v1366_v2, %v1366_v2 }
 0x501   : > { %1982 = vmatmul.mubr.msk.bf16.vlgmr.msra.gmra.mxu1 %vm689_vm0, %v1367_v3 }
 0x502   : > { %2001 = vmatprep.mubr.msk.bf16.mxu1 %vm2345_vm1, %v2344_v0 }
 0x5c1   : > { %v1423_v5 = vpop.f32.mrf.mxu1 }
 0x5c2   : > { %v1429_v7 = vadd.f32 %v1423_v5, %v1365_v4 }
 0x5c3   : > { %v1983_v8 = vpop.f32.mrf.mxu1 }
 0x5c4   : > { %1430 = vst.msk [vmem:[#allocation2] sm:$0xff] %vm689_vm0, %v1429_v7 }
 0x5c5   : > { %v1426_v9 = vpop.f32.mrf.mxu1 }
 0x5c7   : > { %v1984_v10 = vpop.f32.mrf.mxu1 }
 0x5cb   : > { %v1434_v12 = vld [vmem:[#allocation2] sm:$0xff] }
 0x5cc   : > { %v1442_v13 = vadd.f32 %v1850_v11, %v1434_v12 }
 0x5ce   : > { %v1443_v14 = vmul.f32 2.0, %v1442_v13 }
 0x5d0   : > { %v1445_v15 = vadd.f32 %v1443_v14, %v2621_v6  ;;  %v2118_v6 = vld [vmem:[%s2810_s14 + $0x18] sm:$0xff]  }
 0x5d1   : > { %1994 = vmatpush3.bf16.msra.mxu1 %v2118_v6 }
 0x5d2   : > { %v1448_v16 = vsel %vm689_vm0, %v1445_v15, 0.0  ;;  %1995 = vmatprep.subr.bf16.mxu1 %v2344_v0 }
 0x5d3   : > { %1449 = vadd.xlane.f32.xlu0 %v1448_v16 }
 0x5d5   : > { %1996 = vmatpush3.bf16.msra.mxu1 %v2119_v24 }
 0x5d6   : > { %1997 = vmatprep.subr.bf16.mxu1 %v2344_v0 }
 0x5d9   : > { %1998 = vmatpush3.bf16.msra.mxu1 %v2120_v35 }
 0x5da   : > { %1999 = vmatprep.subr.bf16.mxu1 %v2344_v0  ;;  %v1857_v0 = vld [vmem:[%s2860_s8] ss:$0 sm:$0xff]  ;;  %s1672_s8 = scalar_lea.hbm %s2864_s16, %s1866_s17 }
 0x5dd   : > { %2000 = vmatpush3.bf16.msra.mxu1 %v2121_v36 }
 0x65c   : > { %v1450_v17 = vpop.xlane.xlu0 %1449 }
 0x65d   : > { %v1452_v18 = vmul.f32 0.03125, %v1450_v17 }
 0x65f   : > { %v1453_v19 = vsub.f32 %v1445_v15, %v1452_v18 }
 0x661   : > { %v1454_v20 = vmul.f32 %v1453_v19, %v1453_v19 }
 0x663   : > { %v1455_v21 = vsel %vm689_vm0, %v1454_v20, 0.0 }
 0x664   : > { %1456 = vadd.xlane.f32.xlu1 %v1455_v21 }
 0x6ed   : > { %v1457_v25 = vpop.xlane.xlu1 %1456 }
 0x6ee   : > { %v1458_v26 = vmul.f32 0.03125, %v1457_v25 }
 0x6f0   : > { %v1459_v27 = vadd.f32 1e-12, %v1458_v26 }
 0x6f2   : > { %2138 = vrsqrt.f32 %v1459_v27 }
 0x6ff   : > { %v2139_v28 = vpop.eup %2138 }
 0x700   : > { %v1461_v30 = vmul.f32 %v2139_v28, %v1453_v19 }
 0x702   : > { %v1468_v32 = vmul.f32 %v1851_v29, %v1461_v30 }
 0x704   : > { %v1475_v33 = vadd.f32 %v1852_v31, %v1468_v32 }
 0x706   : > { %v1476_v34 = vpack.c.bf16 %v1475_v33, %v1475_v33 }
 0x708   : > { %1990 = vmatmul.mubr.msk.bf16.vlgmr.msra.gmra.mxu0 %vm689_vm0, %v1476_v34 }
 0x7c8   : > { %v1537_v38 = vpop.f32.mrf.mxu0 }
 0x7c9   : > { %v1538_v39 = vadd.f32 %v1853_v37, %v1537_v38 }
 0x7ca   : > { %v1991_v40 = vpop.f32.mrf.mxu0 }
 0x7cb   : > { %v1543_v41 = vmax.f32 %v1538_v39, 0.0 }
 0x7cc   : > { %v1540_v42 = vpop.f32.mrf.mxu0 }
 0x7cd   : > { %v1544_v43 = vpack.c.bf16 %v1543_v41, %v1543_v41 }
 0x7ce   : > { %v1992_v44 = vpop.f32.mrf.mxu0 }
 0x7cf   : > { %2002 = vmatmul.mubr.msk.bf16.vlgmr.msra.gmra.mxu1 %vm1584_vm8, %v1544_v43 }
 0x88f   : > { %v1622_v45 = vpop.f32.mrf.mxu1 }
 0x890   : > { %v1623_v46 = vadd.f32 %v1857_v0, %v1622_v45 }
 0x891   : > { %v2003_v47 = vpop.f32.mrf.mxu1 }
 0x892   : > { %v1628_v48 = vadd.f32 %v1623_v46, %v1475_v33 }
 0x893   : > { %v1625_v49 = vpop.f32.mrf.mxu1 }
 0x894   : > { %v1631_v50 = vsel %vm689_vm0, %v1628_v48, 0.0 }
 0x895   : > { %1632 = vadd.xlane.f32.xlu0 %v1631_v50  ;;  %v2004_v51 = vpop.f32.mrf.mxu1 }
 0x91e   : > { %v1633_v52 = vpop.xlane.xlu0 %1632 }
 0x91f   : > { %v1634_v53 = vmul.f32 0.03125, %v1633_v52 }
 0x921   : > { %v1635_v54 = vsub.f32 %v1628_v48, %v1634_v53 }
 0x923   : > { %v1636_v55 = vmul.f32 %v1635_v54, %v1635_v54 }
 0x925   : > { %v1637_v56 = vsel %vm689_vm0, %v1636_v55, 0.0 }
 0x926   : > { %1638 = vadd.xlane.f32.xlu0 %v1637_v56 }
 0x9af   : > { %v1639_v57 = vpop.xlane.xlu0 %1638 }
 0x9b0   : > { %v1640_v58 = vmul.f32 0.03125, %v1639_v57 }
 0x9b2   : > { %v1641_v59 = vadd.f32 1e-12, %v1640_v58 }
 0x9b4   : > { %2140 = vrsqrt.f32 %v1641_v59 }
 0x9c1   : > { %v2141_v60 = vpop.eup %2140 }
 0x9c2   : > { %v1643_v62 = vmul.f32 %v2141_v60, %v1635_v54 }
 0x9c4   : > { %v1650_v1 = vmul.f32 %v1863_v61, %v1643_v62 }
 0x9c6   : > { %v1657_v2 = vadd.f32 %v1864_v63, %v1650_v1 }
 0x9c8   : > { %1658 = vst.msk [vmem:[%s676_s13] sm:$0xff] %vm689_vm0, %v1657_v2 }
 0x9c9   : > { %2261 = shalt.err (!%p2258_p1)
}
 0x9ca   : > { %s2262_s12 = scalar_lea.hbm %s1672_s8, 128  ;;  %s2266_s26 = scalar_lea.hbm %s2864_s16, 256 }
 0x9cb   : > { %p2263_p4 = scmp.ne.s32.totalorder %s1672_s8, %s2262_s12  ;;  %p2267_p5 = scmp.lt.s32.totalorder %s1672_s8, %s2864_s16 }
 0x9cc   : > { %p2268_p3 = scmp.lt.s32.totalorder %s2266_s26, %s2262_s12 }
 0x9cd   : > { %p2264_p8 = pnand %p2263_p4, %p2548_p0 }
 0x9ce   : > { %p2269_p10 = por %p2268_p3, %p2267_p5 }
 0x9cf   : > { %p2265_p12 = pneg %p2264_p8 }
 0x9d1   : > { %p2270_p2 = pnand %p2269_p10, %p2265_p12 }
 0x9d3   : > { %2273 = shalt.err (!%p2270_p2)
}
 0x9d4   : > { %2019 = dma.vmem_to_hbm [thread:$0]  (%p2548_p0), %s1675_s25, 128, %s1672_s8, %s1660_s1  }
 0x9d5 PF: > { %s2865_s13 = sld [smem:[#allocation18_spill]]  ;;  %p2868_p7 = scmp.ge.s32.totalorder %s2336_s19, 2 }
 0x9d6   : > { %s2866_s27 = sld [smem:[#allocation19_spill]] }
 0x9db   : > { %s1686_s18 = sand.u32 1, %s2865_s13  }
 0x9dc   : > { %p2867_p11 = scmp.ne.s32.totalorder %s2866_s27, 0  ;;  %s1687_s2 = scalar_lea.sflag [#allocation7], %s1686_s18 }
 0x9de   : > { %p2036_p6 = pnand %p2868_p7, %p2867_p11 }
 0x9e0   : > { %p2037_p9 = pneg %p2036_p6 }
 0x9e2   : > { %2311 = dma.done.wait (%p2037_p9), %s1687_s2, 128  }
 0x9e3   : > { %2313 = vsyncadd (%p2037_p9), %s1687_s2, 4294967168  ;;  %s36_s19 = sadd.s32 1, %s2336_s19   ;;  %s2869_s1 = sld [smem:[#allocation21_spill]] }
 0x9e4   : > { %p33_p13 = scmp.ge.s32.totalorder %s36_s19, 4   ;;  %s2870_s27 = smov %s2320_s28 }
 0x9e5   : > { %s2871_s28 = smov %s2324_s29  ;;  %s2872_s29 = smov %s2560_s20 }
 0x9e6   : > { %s2873_s30 = smov %s2332_s0  ;;  %35 = sbr.rel (!%p33_p13) target bundleno = 20 (0x14), region = 167 }
 0x9e9   : > { %s2874_s0 = smov %s2869_s1 }
 0x9eb   :  { %1692 = vsyncpa [#allocation6], 1 }
 0x9ec   :  { %1694 = vsyncpa [#allocation6 + $0x1], 1 }
 0x9ed   :  { %1695 = vsyncpa [#allocation9], 1 }
 0x9ee   :  { %1696 = vsyncpa [#allocation12], 1 }
 0x9ef   :  { %1697 = vsyncpa [#allocation7], 1 }
 0x9f0   :  { %1699 = vsyncpa [#allocation7 + $0x1], 1 }

</bundles_post_ra>
